<compile_context>
chip_gen: v6e
topology: v6e:2x2x1
jax: 0.10.0
libtpu: 0.0.40
codegen_flags: <defaults>
</compile_context>

<pallas_src>
import math

import jax
import jax.numpy as jnp
import numpy as np
from jax.experimental import pallas as pl
from jax.experimental.pallas import tpu as pltpu


def make_gla_kernel(*, num_heads, head_size, scale, block_b, lq, lk, channels,
                    compute_dtype):
    rows_q = block_b * lq
    rows_k = block_b * lk

    def gla_kernel(local_ref, global_ref,
                   wq_ref, bq_ref, wkv_ref, bkv_ref, wo_ref, bo_ref,
                   out_ref, ctx_ref):
        # ---- Projections over the whole (block_b * L, C) slab:
        #      bf16 inputs, f32 accumulation on the MXU.  K and V share one
        #      matmul against the fused (C, 2C) weight. ----
        lx = local_ref[...].reshape(rows_q, channels).astype(compute_dtype)
        gx = global_ref[...].reshape(rows_k, channels).astype(compute_dtype)

        q = jnp.dot(lx, wq_ref[...], preferred_element_type=jnp.float32) + bq_ref[...]
        kv = jnp.dot(gx, wkv_ref[...], preferred_element_type=jnp.float32) + bkv_ref[...]

        # Fold the 1/sqrt(head_size) scale once into q (not per-head scores).
        q = (q * scale).astype(compute_dtype)
        # C % 128 == 0 -> these slices are lane-tile aligned (free).
        k = kv[:, :channels].astype(compute_dtype)
        v = kv[:, channels:].astype(compute_dtype)

        # ---- Per-head attention, batched over the batch block.  The einsum
        # contracts on the head dim directly (no per-head transpose).  Head
        # contexts land in a bf16 (rows_q, C) VMEM scratch at static column
        # offsets. ----
        # TODO(synk): replace the static head unroll with a single batched
        # einsum over the head axis once Mosaic dot_general with two batch
        # dims is verified on the target JAX version; also add a KV grid axis
        # with online-softmax (flash-style) accumulation for long Lk so the
        # (Lq, Lk) scores never fully materialize in VMEM.
        for h in range(num_heads):
            c0 = h * head_size
            c1 = c0 + head_size
            qh = q[:, c0:c1].reshape(block_b, lq, head_size)
            kh = k[:, c0:c1].reshape(block_b, lk, head_size)
            vh = v[:, c0:c1].reshape(block_b, lk, head_size)

            # f32 scores / softmax (stable: max-subtracted).
            s = jnp.einsum('bqd,bkd->bqk', qh, kh,
                           preferred_element_type=jnp.float32)
            s = s - jnp.max(s, axis=-1, keepdims=True)
            p = jnp.exp(s)
            p = p * pl.reciprocal(jnp.sum(p, axis=-1, keepdims=True), approx=True)

            ctx_h = jnp.einsum('bqk,bkd->bqd', p.astype(compute_dtype), vh,
                               preferred_element_type=jnp.float32)
            ctx_ref[:, c0:c1] = (ctx_h.reshape(rows_q, head_size)
                                 .astype(compute_dtype))

        # ---- Single output projection over the whole block. ----
        out = (jnp.dot(ctx_ref[...], wo_ref[...],
                       preferred_element_type=jnp.float32) + bo_ref[...])
        out_ref[...] = out.reshape(block_b, lq, channels).astype(out_ref.dtype)

    return gla_kernel


def _block_vmem_bytes(block_b, lq, lk, channels):
    """Rough per-step VMEM estimate for one batch block (bytes)."""
    io = 2 * (block_b * lq * channels        # local_x (double-buffered, f32)
              + block_b * lk * channels      # global_x
              + block_b * lq * channels) * 4  # output
    qkv = block_b * (lq * channels + 2 * lk * channels) * 4   # q + kv (f32)
    scores = 2 * block_b * lq * lk * 4                         # s, p (per head)
    ctx = block_b * lq * channels * 2                          # bf16 scratch
    return io + qkv + scores + ctx


def _pick_block_b(batch, lq, lk, channels, *, vmem_budget=40 * 1024 * 1024):
    """Largest divisor of `batch` whose per-step footprint fits the budget.
    On single-TC chips (v5e/v6e) fewer grid steps is strictly better; the tiny
    demo collapses to a single step."""
    # TODO(synk): on v7x (2 TensorCores) prefer an even number of grid steps
    # when the grid has more than one step.
    divisors = [d for d in range(1, batch + 1) if batch % d == 0]
    fitting = [d for d in divisors if _block_vmem_bytes(d, lq, lk, channels)
               <= vmem_budget]
    return max(fitting) if fitting else 1


def gla_forward(local_x, global_x, params, *, num_heads,
                compute_dtype=jnp.bfloat16, block_b=None):
    """Pallas-backed GLA_module.forward.

    local_x:(B,Lq,C)  global_x:(B,Lk,C)
    params = (wq,bq,wk,bk,wv,bv,wo,bo); weights (C,C) stored (in,out), biases (1,C).
    """
    B, Lq, C = local_x.shape
    Bk, Lk, Ck = global_x.shape
    assert Bk == B and Ck == C
    assert C % num_heads == 0, "channel must be divisible by num_heads"
    # NOTE: C (and ideally head_size) being a multiple of 128 keeps stores
    # lane-dense; smaller values are correct but slower.
    head_size = C // num_heads
    scale = 1.0 / math.sqrt(head_size)

    if block_b is None:
        block_b = _pick_block_b(B, Lq, Lk, C)
    assert B % block_b == 0

    wq, bq, wk, bk, wv, bv, wo, bo = params
    # Fuse K|V projection weights -> one (C, 2C) matmul on the gx slab.
    wkv = jnp.concatenate([wk, wv], axis=1)
    bkv = jnp.concatenate([bk, bv], axis=1)
    # Weights in bf16 (halves weight DMA, full-rate MXU); biases stay f32 and
    # are added after f32 accumulation.
    wq, wkv, wo = (w.astype(compute_dtype) for w in (wq, wkv, wo))
    bq, bkv, bo = (b.astype(jnp.float32) for b in (bq, bkv, bo))

    kernel = make_gla_kernel(
        num_heads=num_heads, head_size=head_size, scale=scale,
        block_b=block_b, lq=Lq, lk=Lk, channels=C, compute_dtype=compute_dtype)

    # Weights/biases are grid-invariant (constant index_map) -> fetched once.
    # TODO(synk): on v7x with large C, add pipeline_mode=pl.Buffered(1) to
    # these specs to drop their second (double-buffer) VMEM copy.
    weight_spec = pl.BlockSpec((C, C), lambda b: (0, 0))
    kv_weight_spec = pl.BlockSpec((C, 2 * C), lambda b: (0, 0))
    bias_spec = pl.BlockSpec((1, C), lambda b: (0, 0))
    kv_bias_spec = pl.BlockSpec((1, 2 * C), lambda b: (0, 0))

    weight_bytes = 2 * (2 * C * C + C * 2 * C) * 2 + (4 * C) * 4
    est = _block_vmem_bytes(block_b, Lq, Lk, C) + weight_bytes
    # Generous multiplier for compiler temporaries, capped well under v7x's
    # 64 MiB physical VMEM per TensorCore.
    vmem_limit = int(min(48 * 1024 * 1024, max(16 * 1024 * 1024, 2 * est)))

    return pl.pallas_call(
        kernel,
        out_shape=jax.ShapeDtypeStruct((B, Lq, C), local_x.dtype),
        grid_spec=pltpu.PrefetchScalarGridSpec(
            num_scalar_prefetch=0,
            grid=(B // block_b,),
            in_specs=[
                pl.BlockSpec((block_b, Lq, C), lambda b: (b, 0, 0)),   # local_x
                pl.BlockSpec((block_b, Lk, C), lambda b: (b, 0, 0)),   # global_x
                weight_spec, bias_spec,                                # query
                kv_weight_spec, kv_bias_spec,                          # key|value
                weight_spec, bias_spec,                                # out
            ],
            out_specs=pl.BlockSpec((block_b, Lq, C), lambda b: (b, 0, 0)),
            scratch_shapes=[pltpu.VMEM((block_b * Lq, C), compute_dtype)],
        ),
        compiler_params=pltpu.CompilerParams(
            dimension_semantics=("parallel",),
            vmem_limit_bytes=vmem_limit),
    )(local_x, global_x, wq, bq, wkv, bkv, wo, bo)


def gla_reference(local_x, global_x, params, *, num_heads):
    """Pure-JAX (f32) reference mirroring the PyTorch forward."""
    wq, bq, wk, bk, wv, bv, wo, bo = params
    B, Lq, C = local_x.shape
    Lk = global_x.shape[1]
    D = C // num_heads

    q = local_x @ wq + bq[0]
    k = global_x @ wk + bk[0]
    v = global_x @ wv + bv[0]

    def split(x, L):
        return x.reshape(B, L, num_heads, D).transpose(0, 2, 1, 3)

    qh, kh, vh = split(q, Lq), split(k, Lk), split(v, Lk)
    s = jnp.einsum('bhqd,bhkd->bhqk', qh, kh) / math.sqrt(D)
    p = jax.nn.softmax(s, axis=-1)
    ctx = jnp.einsum('bhqk,bhkd->bhqd', p, vh)
    ctx = ctx.transpose(0, 2, 1, 3).reshape(B, Lq, C)
    return ctx @ wo + bo[0]


if __name__ == "__main__":
    # Small shapes consistent with the module (channel divisible by heads;
    # C = 128 keeps lanes dense).
    B, Lq, Lk, C, H = 4, 8, 8, 128, 4

    key = jax.random.PRNGKey(0)
    keys = jax.random.split(key, 10)
    local_x = jax.random.normal(keys[0], (B, Lq, C), jnp.float32)
    global_x = jax.random.normal(keys[1], (B, Lk, C), jnp.float32)

    def lin(kw, kb):
        w = 0.05 * jax.random.normal(kw, (C, C), jnp.float32)   # (in, out)
        b = 0.05 * jax.random.normal(kb, (1, C), jnp.float32)
        return w, b

    wq, bq = lin(keys[2], keys[3])
    wk, bk = lin(keys[4], keys[5])
    wv, bv = lin(keys[6], keys[7])
    wo, bo = lin(keys[8], keys[9])
    params = (wq, bq, wk, bk, wv, bv, wo, bo)

    out = gla_forward(local_x, global_x, params, num_heads=H)
    out = jax.block_until_ready(out)

    ref = gla_reference(local_x, global_x, params, num_heads=H)
    # Looser tolerance than pure-f32: matmul inputs are bf16 (f32 accumulation)
    # and the softmax denominator uses the approx EUP reciprocal.
    np.testing.assert_allclose(np.asarray(out), np.asarray(ref),
                               rtol=2e-2, atol=2e-2)
    print("KERNEL_OK")
</pallas_src>

<mosaic_0001>
module attributes {stable_mosaic.version = 11 : i64} {
  func.func @gla_kernel(%arg0: i32, %arg1: memref<4x8x128xf32, #tpu.memory_space<vmem>>, %arg2: memref<4x8x128xf32, #tpu.memory_space<vmem>>, %arg3: memref<128x128xbf16, #tpu.memory_space<vmem>>, %arg4: memref<1x128xf32, #tpu.memory_space<vmem>>, %arg5: memref<128x256xbf16, #tpu.memory_space<vmem>>, %arg6: memref<1x256xf32, #tpu.memory_space<vmem>>, %arg7: memref<128x128xbf16, #tpu.memory_space<vmem>>, %arg8: memref<1x128xf32, #tpu.memory_space<vmem>>, %arg9: memref<4x8x128xf32, #tpu.memory_space<vmem>>, %arg10: memref<32x128xbf16, #tpu.memory_space<vmem>>) attributes {dimension_semantics = [#tpu.dimension_semantics<parallel>], iteration_bounds = array<i64: 1>, scalar_prefetch = 0 : i64, scratch_operands = 1 : i64, tpu.core_type = #tpu.core_type<tc>, window_params = [{transform_indices = @transform_0, window_bounds = array<i64: 4, 8, 128>}, {transform_indices = @transform_1, window_bounds = array<i64: 4, 8, 128>}, {pipeline_mode = #tpu.pipeline_mode<synchronous>, transform_indices = @transform_2, window_bounds = array<i64: 128, 128>}, {pipeline_mode = #tpu.pipeline_mode<synchronous>, transform_indices = @transform_3, window_bounds = array<i64: 1, 128>}, {pipeline_mode = #tpu.pipeline_mode<synchronous>, transform_indices = @transform_4, window_bounds = array<i64: 128, 256>}, {pipeline_mode = #tpu.pipeline_mode<synchronous>, transform_indices = @transform_5, window_bounds = array<i64: 1, 256>}, {pipeline_mode = #tpu.pipeline_mode<synchronous>, transform_indices = @transform_6, window_bounds = array<i64: 128, 128>}, {pipeline_mode = #tpu.pipeline_mode<synchronous>, transform_indices = @transform_7, window_bounds = array<i64: 1, 128>}, {transform_indices = @transform_8, window_bounds = array<i64: 4, 8, 128>}]} {
    %c0 = arith.constant 0 : index
    %c0_0 = arith.constant 0 : index
    %c0_1 = arith.constant 0 : index
    %0 = vector.load %arg1[%c0, %c0_0, %c0_1] : memref<4x8x128xf32, #tpu.memory_space<vmem>>, vector<4x8x128xf32>
    %1 = vector.shape_cast %0 : vector<4x8x128xf32> to vector<32x128xf32>
    %2 = arith.truncf %1 : vector<32x128xf32> to vector<32x128xbf16>
    %c0_2 = arith.constant 0 : index
    %c0_3 = arith.constant 0 : index
    %c0_4 = arith.constant 0 : index
    %3 = vector.load %arg2[%c0_2, %c0_3, %c0_4] : memref<4x8x128xf32, #tpu.memory_space<vmem>>, vector<4x8x128xf32>
    %4 = vector.shape_cast %3 : vector<4x8x128xf32> to vector<32x128xf32>
    %5 = arith.truncf %4 : vector<32x128xf32> to vector<32x128xbf16>
    %c0_5 = arith.constant 0 : index
    %c0_6 = arith.constant 0 : index
    %6 = vector.load %arg3[%c0_5, %c0_6] : memref<128x128xbf16, #tpu.memory_space<vmem>>, vector<128x128xbf16>
    %cst = arith.constant dense<0.000000e+00> : vector<32x128xf32>
    %7 = tpu.matmul %2, %6, %cst {dimension_numbers = #tpu.dot_dimension_numbers<[1], [0], [0], [1], [0, 0, 1, 1], [], []>} : vector<32x128xbf16>, vector<128x128xbf16>, vector<32x128xf32> -> vector<32x128xf32>
    %c0_7 = arith.constant 0 : index
    %c0_8 = arith.constant 0 : index
    %8 = vector.load %arg4[%c0_7, %c0_8] : memref<1x128xf32, #tpu.memory_space<vmem>>, vector<1x128xf32>
    %9 = vector.broadcast %8 : vector<1x128xf32> to vector<32x128xf32>
    %10 = arith.addf %7, %9 : vector<32x128xf32>
    %c0_9 = arith.constant 0 : index
    %c0_10 = arith.constant 0 : index
    %11 = vector.load %arg5[%c0_9, %c0_10] : memref<128x256xbf16, #tpu.memory_space<vmem>>, vector<128x256xbf16>
    %cst_11 = arith.constant dense<0.000000e+00> : vector<32x256xf32>
    %12 = tpu.matmul %5, %11, %cst_11 {dimension_numbers = #tpu.dot_dimension_numbers<[1], [0], [0], [1], [0, 0, 1, 1], [], []>} : vector<32x128xbf16>, vector<128x256xbf16>, vector<32x256xf32> -> vector<32x256xf32>
    %c0_12 = arith.constant 0 : index
    %c0_13 = arith.constant 0 : index
    %13 = vector.load %arg6[%c0_12, %c0_13] : memref<1x256xf32, #tpu.memory_space<vmem>>, vector<1x256xf32>
    %14 = vector.broadcast %13 : vector<1x256xf32> to vector<32x256xf32>
    %15 = arith.addf %12, %14 : vector<32x256xf32>
    %cst_14 = arith.constant 0.176776692 : f32
    %16 = vector.broadcast %cst_14 : f32 to vector<32x128xf32>
    %17 = arith.mulf %10, %16 : vector<32x128xf32>
    %18 = arith.truncf %17 : vector<32x128xf32> to vector<32x128xbf16>
    %19 = vector.extract_strided_slice %15 {offsets = [0, 0], sizes = [32, 128], strides = [1, 1]} : vector<32x256xf32> to vector<32x128xf32>
    %20 = arith.truncf %19 : vector<32x128xf32> to vector<32x128xbf16>
    %21 = vector.extract_strided_slice %15 {offsets = [0, 128], sizes = [32, 128], strides = [1, 1]} : vector<32x256xf32> to vector<32x128xf32>
    %22 = arith.truncf %21 : vector<32x128xf32> to vector<32x128xbf16>
    %23 = vector.extract_strided_slice %18 {offsets = [0, 0], sizes = [32, 32], strides = [1, 1]} : vector<32x128xbf16> to vector<32x32xbf16>
    %24 = vector.shape_cast %23 : vector<32x32xbf16> to vector<4x8x32xbf16>
    %25 = vector.extract_strided_slice %20 {offsets = [0, 0], sizes = [32, 32], strides = [1, 1]} : vector<32x128xbf16> to vector<32x32xbf16>
    %26 = vector.shape_cast %25 : vector<32x32xbf16> to vector<4x8x32xbf16>
    %27 = vector.extract_strided_slice %22 {offsets = [0, 0], sizes = [32, 32], strides = [1, 1]} : vector<32x128xbf16> to vector<32x32xbf16>
    %28 = vector.shape_cast %27 : vector<32x32xbf16> to vector<4x8x32xbf16>
    "tpu.trace_start"() <{level = 10 : i32, message = "bqd,bkd->bqk"}> : () -> ()
    %cst_15 = arith.constant dense<0.000000e+00> : vector<4x8x8xf32>
    %29 = tpu.matmul %24, %26, %cst_15 {dimension_numbers = #tpu.dot_dimension_numbers<[2], [2], [1], [1], [0, 0, 0, 1, 1, 1], [0], [0]>} : vector<4x8x32xbf16>, vector<4x8x32xbf16>, vector<4x8x8xf32> -> vector<4x8x8xf32>
    "tpu.trace_stop"() : () -> ()
    %cst_16 = arith.constant dense<0xFF800000> : vector<4x8xf32>
    %30 = vector.multi_reduction <maximumf>, %29, %cst_16 [2] : vector<4x8x8xf32> to vector<4x8xf32>
    %31 = vector.shape_cast %30 : vector<4x8xf32> to vector<4x8x1xf32>
    %32 = vector.broadcast %31 : vector<4x8x1xf32> to vector<4x8x8xf32>
    %33 = arith.subf %29, %32 : vector<4x8x8xf32>
    %34 = math.exp %33 : vector<4x8x8xf32>
    %cst_17 = arith.constant dense<0.000000e+00> : vector<4x8xf32>
    %35 = vector.multi_reduction <add>, %34, %cst_17 [2] : vector<4x8x8xf32> to vector<4x8xf32>
    %36 = vector.shape_cast %35 : vector<4x8xf32> to vector<4x8x1xf32>
    %37 = tpu.reciprocal %36 {approx = true} : vector<4x8x1xf32> -> vector<4x8x1xf32>
    %38 = vector.broadcast %37 : vector<4x8x1xf32> to vector<4x8x8xf32>
    %39 = arith.mulf %34, %38 : vector<4x8x8xf32>
    %40 = arith.truncf %39 : vector<4x8x8xf32> to vector<4x8x8xbf16>
    "tpu.trace_start"() <{level = 10 : i32, message = "bqk,bkd->bqd"}> : () -> ()
    %cst_18 = arith.constant dense<0.000000e+00> : vector<4x8x32xf32>
    %41 = tpu.matmul %40, %28, %cst_18 {dimension_numbers = #tpu.dot_dimension_numbers<[2], [1], [1], [2], [0, 0, 0, 1, 1, 2], [0], [0]>} : vector<4x8x8xbf16>, vector<4x8x32xbf16>, vector<4x8x32xf32> -> vector<4x8x32xf32>
    "tpu.trace_stop"() : () -> ()
    %42 = vector.shape_cast %41 : vector<4x8x32xf32> to vector<32x32xf32>
    %43 = arith.truncf %42 : vector<32x32xf32> to vector<32x32xbf16>
    %c0_19 = arith.constant 0 : index
    %c0_20 = arith.constant 0 : index
    %44 = vector.load %arg10[%c0_19, %c0_20] : memref<32x128xbf16, #tpu.memory_space<vmem>>, vector<32x32xbf16>
    tpu.vector_store %arg10[%c0_19, %c0_20], %43 {strides = array<i32>} : memref<32x128xbf16, #tpu.memory_space<vmem>>, vector<32x32xbf16>,
    %45 = vector.extract_strided_slice %18 {offsets = [0, 32], sizes = [32, 32], strides = [1, 1]} : vector<32x128xbf16> to vector<32x32xbf16>
    %46 = vector.shape_cast %45 : vector<32x32xbf16> to vector<4x8x32xbf16>
    %47 = vector.extract_strided_slice %20 {offsets = [0, 32], sizes = [32, 32], strides = [1, 1]} : vector<32x128xbf16> to vector<32x32xbf16>
    %48 = vector.shape_cast %47 : vector<32x32xbf16> to vector<4x8x32xbf16>
    %49 = vector.extract_strided_slice %22 {offsets = [0, 32], sizes = [32, 32], strides = [1, 1]} : vector<32x128xbf16> to vector<32x32xbf16>
    %50 = vector.shape_cast %49 : vector<32x32xbf16> to vector<4x8x32xbf16>
    "tpu.trace_start"() <{level = 10 : i32, message = "bqd,bkd->bqk"}> : () -> ()
    %cst_21 = arith.constant dense<0.000000e+00> : vector<4x8x8xf32>
    %51 = tpu.matmul %46, %48, %cst_21 {dimension_numbers = #tpu.dot_dimension_numbers<[2], [2], [1], [1], [0, 0, 0, 1, 1, 1], [0], [0]>} : vector<4x8x32xbf16>, vector<4x8x32xbf16>, vector<4x8x8xf32> -> vector<4x8x8xf32>
    "tpu.trace_stop"() : () -> ()
    %cst_22 = arith.constant dense<0xFF800000> : vector<4x8xf32>
    %52 = vector.multi_reduction <maximumf>, %51, %cst_22 [2] : vector<4x8x8xf32> to vector<4x8xf32>
    %53 = vector.shape_cast %52 : vector<4x8xf32> to vector<4x8x1xf32>
    %54 = vector.broadcast %53 : vector<4x8x1xf32> to vector<4x8x8xf32>
    %55 = arith.subf %51, %54 : vector<4x8x8xf32>
    %56 = math.exp %55 : vector<4x8x8xf32>
    %cst_23 = arith.constant dense<0.000000e+00> : vector<4x8xf32>
    %57 = vector.multi_reduction <add>, %56, %cst_23 [2] : vector<4x8x8xf32> to vector<4x8xf32>
    %58 = vector.shape_cast %57 : vector<4x8xf32> to vector<4x8x1xf32>
    %59 = tpu.reciprocal %58 {approx = true} : vector<4x8x1xf32> -> vector<4x8x1xf32>
    %60 = vector.broadcast %59 : vector<4x8x1xf32> to vector<4x8x8xf32>
    %61 = arith.mulf %56, %60 : vector<4x8x8xf32>
    %62 = arith.truncf %61 : vector<4x8x8xf32> to vector<4x8x8xbf16>
    "tpu.trace_start"() <{level = 10 : i32, message = "bqk,bkd->bqd"}> : () -> ()
    %cst_24 = arith.constant dense<0.000000e+00> : vector<4x8x32xf32>
    %63 = tpu.matmul %62, %50, %cst_24 {dimension_numbers = #tpu.dot_dimension_numbers<[2], [1], [1], [2], [0, 0, 0, 1, 1, 2], [0], [0]>} : vector<4x8x8xbf16>, vector<4x8x32xbf16>, vector<4x8x32xf32> -> vector<4x8x32xf32>
    "tpu.trace_stop"() : () -> ()
    %64 = vector.shape_cast %63 : vector<4x8x32xf32> to vector<32x32xf32>
    %65 = arith.truncf %64 : vector<32x32xf32> to vector<32x32xbf16>
    %c0_25 = arith.constant 0 : index
    %c32 = arith.constant 32 : index
    %66 = vector.load %arg10[%c0_25, %c32] : memref<32x128xbf16, #tpu.memory_space<vmem>>, vector<32x32xbf16>
    tpu.vector_store %arg10[%c0_25, %c32], %65 {strides = array<i32>} : memref<32x128xbf16, #tpu.memory_space<vmem>>, vector<32x32xbf16>,
    %67 = vector.extract_strided_slice %18 {offsets = [0, 64], sizes = [32, 32], strides = [1, 1]} : vector<32x128xbf16> to vector<32x32xbf16>
    %68 = vector.shape_cast %67 : vector<32x32xbf16> to vector<4x8x32xbf16>
    %69 = vector.extract_strided_slice %20 {offsets = [0, 64], sizes = [32, 32], strides = [1, 1]} : vector<32x128xbf16> to vector<32x32xbf16>
    %70 = vector.shape_cast %69 : vector<32x32xbf16> to vector<4x8x32xbf16>
    %71 = vector.extract_strided_slice %22 {offsets = [0, 64], sizes = [32, 32], strides = [1, 1]} : vector<32x128xbf16> to vector<32x32xbf16>
    %72 = vector.shape_cast %71 : vector<32x32xbf16> to vector<4x8x32xbf16>
    "tpu.trace_start"() <{level = 10 : i32, message = "bqd,bkd->bqk"}> : () -> ()
    %cst_26 = arith.constant dense<0.000000e+00> : vector<4x8x8xf32>
    %73 = tpu.matmul %68, %70, %cst_26 {dimension_numbers = #tpu.dot_dimension_numbers<[2], [2], [1], [1], [0, 0, 0, 1, 1, 1], [0], [0]>} : vector<4x8x32xbf16>, vector<4x8x32xbf16>, vector<4x8x8xf32> -> vector<4x8x8xf32>
    "tpu.trace_stop"() : () -> ()
    %cst_27 = arith.constant dense<0xFF800000> : vector<4x8xf32>
    %74 = vector.multi_reduction <maximumf>, %73, %cst_27 [2] : vector<4x8x8xf32> to vector<4x8xf32>
    %75 = vector.shape_cast %74 : vector<4x8xf32> to vector<4x8x1xf32>
    %76 = vector.broadcast %75 : vector<4x8x1xf32> to vector<4x8x8xf32>
    %77 = arith.subf %73, %76 : vector<4x8x8xf32>
    %78 = math.exp %77 : vector<4x8x8xf32>
    %cst_28 = arith.constant dense<0.000000e+00> : vector<4x8xf32>
    %79 = vector.multi_reduction <add>, %78, %cst_28 [2] : vector<4x8x8xf32> to vector<4x8xf32>
    %80 = vector.shape_cast %79 : vector<4x8xf32> to vector<4x8x1xf32>
    %81 = tpu.reciprocal %80 {approx = true} : vector<4x8x1xf32> -> vector<4x8x1xf32>
    %82 = vector.broadcast %81 : vector<4x8x1xf32> to vector<4x8x8xf32>
    %83 = arith.mulf %78, %82 : vector<4x8x8xf32>
    %84 = arith.truncf %83 : vector<4x8x8xf32> to vector<4x8x8xbf16>
    "tpu.trace_start"() <{level = 10 : i32, message = "bqk,bkd->bqd"}> : () -> ()
    %cst_29 = arith.constant dense<0.000000e+00> : vector<4x8x32xf32>
    %85 = tpu.matmul %84, %72, %cst_29 {dimension_numbers = #tpu.dot_dimension_numbers<[2], [1], [1], [2], [0, 0, 0, 1, 1, 2], [0], [0]>} : vector<4x8x8xbf16>, vector<4x8x32xbf16>, vector<4x8x32xf32> -> vector<4x8x32xf32>
    "tpu.trace_stop"() : () -> ()
    %86 = vector.shape_cast %85 : vector<4x8x32xf32> to vector<32x32xf32>
    %87 = arith.truncf %86 : vector<32x32xf32> to vector<32x32xbf16>
    %c0_30 = arith.constant 0 : index
    %c64 = arith.constant 64 : index
    %88 = vector.load %arg10[%c0_30, %c64] : memref<32x128xbf16, #tpu.memory_space<vmem>>, vector<32x32xbf16>
    tpu.vector_store %arg10[%c0_30, %c64], %87 {strides = array<i32>} : memref<32x128xbf16, #tpu.memory_space<vmem>>, vector<32x32xbf16>,
    %89 = vector.extract_strided_slice %18 {offsets = [0, 96], sizes = [32, 32], strides = [1, 1]} : vector<32x128xbf16> to vector<32x32xbf16>
    %90 = vector.shape_cast %89 : vector<32x32xbf16> to vector<4x8x32xbf16>
    %91 = vector.extract_strided_slice %20 {offsets = [0, 96], sizes = [32, 32], strides = [1, 1]} : vector<32x128xbf16> to vector<32x32xbf16>
    %92 = vector.shape_cast %91 : vector<32x32xbf16> to vector<4x8x32xbf16>
    %93 = vector.extract_strided_slice %22 {offsets = [0, 96], sizes = [32, 32], strides = [1, 1]} : vector<32x128xbf16> to vector<32x32xbf16>
    %94 = vector.shape_cast %93 : vector<32x32xbf16> to vector<4x8x32xbf16>
    "tpu.trace_start"() <{level = 10 : i32, message = "bqd,bkd->bqk"}> : () -> ()
    %cst_31 = arith.constant dense<0.000000e+00> : vector<4x8x8xf32>
    %95 = tpu.matmul %90, %92, %cst_31 {dimension_numbers = #tpu.dot_dimension_numbers<[2], [2], [1], [1], [0, 0, 0, 1, 1, 1], [0], [0]>} : vector<4x8x32xbf16>, vector<4x8x32xbf16>, vector<4x8x8xf32> -> vector<4x8x8xf32>
    "tpu.trace_stop"() : () -> ()
    %cst_32 = arith.constant dense<0xFF800000> : vector<4x8xf32>
    %96 = vector.multi_reduction <maximumf>, %95, %cst_32 [2] : vector<4x8x8xf32> to vector<4x8xf32>
    %97 = vector.shape_cast %96 : vector<4x8xf32> to vector<4x8x1xf32>
    %98 = vector.broadcast %97 : vector<4x8x1xf32> to vector<4x8x8xf32>
    %99 = arith.subf %95, %98 : vector<4x8x8xf32>
    %100 = math.exp %99 : vector<4x8x8xf32>
    %cst_33 = arith.constant dense<0.000000e+00> : vector<4x8xf32>
    %101 = vector.multi_reduction <add>, %100, %cst_33 [2] : vector<4x8x8xf32> to vector<4x8xf32>
    %102 = vector.shape_cast %101 : vector<4x8xf32> to vector<4x8x1xf32>
    %103 = tpu.reciprocal %102 {approx = true} : vector<4x8x1xf32> -> vector<4x8x1xf32>
    %104 = vector.broadcast %103 : vector<4x8x1xf32> to vector<4x8x8xf32>
    %105 = arith.mulf %100, %104 : vector<4x8x8xf32>
    %106 = arith.truncf %105 : vector<4x8x8xf32> to vector<4x8x8xbf16>
    "tpu.trace_start"() <{level = 10 : i32, message = "bqk,bkd->bqd"}> : () -> ()
    %cst_34 = arith.constant dense<0.000000e+00> : vector<4x8x32xf32>
    %107 = tpu.matmul %106, %94, %cst_34 {dimension_numbers = #tpu.dot_dimension_numbers<[2], [1], [1], [2], [0, 0, 0, 1, 1, 2], [0], [0]>} : vector<4x8x8xbf16>, vector<4x8x32xbf16>, vector<4x8x32xf32> -> vector<4x8x32xf32>
    "tpu.trace_stop"() : () -> ()
    %108 = vector.shape_cast %107 : vector<4x8x32xf32> to vector<32x32xf32>
    %109 = arith.truncf %108 : vector<32x32xf32> to vector<32x32xbf16>
    %c0_35 = arith.constant 0 : index
    %c96 = arith.constant 96 : index
    %110 = vector.load %arg10[%c0_35, %c96] : memref<32x128xbf16, #tpu.memory_space<vmem>>, vector<32x32xbf16>
    tpu.vector_store %arg10[%c0_35, %c96], %109 {strides = array<i32>} : memref<32x128xbf16, #tpu.memory_space<vmem>>, vector<32x32xbf16>,
    %c0_36 = arith.constant 0 : index
    %c0_37 = arith.constant 0 : index
    %111 = vector.load %arg10[%c0_36, %c0_37] : memref<32x128xbf16, #tpu.memory_space<vmem>>, vector<32x128xbf16>
    %c0_38 = arith.constant 0 : index
    %c0_39 = arith.constant 0 : index
    %112 = vector.load %arg7[%c0_38, %c0_39] : memref<128x128xbf16, #tpu.memory_space<vmem>>, vector<128x128xbf16>
    %cst_40 = arith.constant dense<0.000000e+00> : vector<32x128xf32>
    %113 = tpu.matmul %111, %112, %cst_40 {dimension_numbers = #tpu.dot_dimension_numbers<[1], [0], [0], [1], [0, 0, 1, 1], [], []>} : vector<32x128xbf16>, vector<128x128xbf16>, vector<32x128xf32> -> vector<32x128xf32>
    %c0_41 = arith.constant 0 : index
    %c0_42 = arith.constant 0 : index
    %114 = vector.load %arg8[%c0_41, %c0_42] : memref<1x128xf32, #tpu.memory_space<vmem>>, vector<1x128xf32>
    %115 = vector.broadcast %114 : vector<1x128xf32> to vector<32x128xf32>
    %116 = arith.addf %113, %115 : vector<32x128xf32>
    %117 = vector.shape_cast %116 : vector<32x128xf32> to vector<4x8x128xf32>
    %c0_43 = arith.constant 0 : index
    %c0_44 = arith.constant 0 : index
    %c0_45 = arith.constant 0 : index
    %118 = vector.load %arg9[%c0_43, %c0_44, %c0_45] : memref<4x8x128xf32, #tpu.memory_space<vmem>>, vector<4x8x128xf32>
    tpu.vector_store %arg9[%c0_43, %c0_44, %c0_45], %117 {strides = array<i32>} : memref<4x8x128xf32, #tpu.memory_space<vmem>>, vector<4x8x128xf32>,
    return
  }
  func.func @transform_0(%arg0: i32) -> (i32, i32, i32) {
    %c0_i32 = arith.constant 0 : i32
    %c0_i32_0 = arith.constant 0 : i32
    %c0_i32_1 = arith.constant 0 : i32
    return %arg0, %c0_i32, %c0_i32_0 : i32, i32, i32
  }
  func.func @transform_1(%arg0: i32) -> (i32, i32, i32) {
    %c0_i32 = arith.constant 0 : i32
    %c0_i32_0 = arith.constant 0 : i32
    %c0_i32_1 = arith.constant 0 : i32
    return %arg0, %c0_i32, %c0_i32_0 : i32, i32, i32
  }
  func.func @transform_2(%arg0: i32) -> (i32, i32) {
    %c0_i32 = arith.constant 0 : i32
    %c0_i32_0 = arith.constant 0 : i32
    %c0_i32_1 = arith.constant 0 : i32
    return %c0_i32, %c0_i32_0 : i32, i32
  }
  func.func @transform_3(%arg0: i32) -> (i32, i32) {
    %c0_i32 = arith.constant 0 : i32
    %c0_i32_0 = arith.constant 0 : i32
    %c0_i32_1 = arith.constant 0 : i32
    return %c0_i32, %c0_i32_0 : i32, i32
  }
  func.func @transform_4(%arg0: i32) -> (i32, i32) {
    %c0_i32 = arith.constant 0 : i32
    %c0_i32_0 = arith.constant 0 : i32
    %c0_i32_1 = arith.constant 0 : i32
    return %c0_i32, %c0_i32_0 : i32, i32
  }
  func.func @transform_5(%arg0: i32) -> (i32, i32) {
    %c0_i32 = arith.constant 0 : i32
    %c0_i32_0 = arith.constant 0 : i32
    %c0_i32_1 = arith.constant 0 : i32
    return %c0_i32, %c0_i32_0 : i32, i32
  }
  func.func @transform_6(%arg0: i32) -> (i32, i32) {
    %c0_i32 = arith.constant 0 : i32
    %c0_i32_0 = arith.constant 0 : i32
    %c0_i32_1 = arith.constant 0 : i32
    return %c0_i32, %c0_i32_0 : i32, i32
  }
  func.func @transform_7(%arg0: i32) -> (i32, i32) {
    %c0_i32 = arith.constant 0 : i32
    %c0_i32_0 = arith.constant 0 : i32
    %c0_i32_1 = arith.constant 0 : i32
    return %c0_i32, %c0_i32_0 : i32, i32
  }
  func.func @transform_8(%arg0: i32) -> (i32, i32, i32) {
    %c0_i32 = arith.constant 0 : i32
    %c0_i32_0 = arith.constant 0 : i32
    %c0_i32_1 = arith.constant 0 : i32
    return %arg0, %c0_i32, %c0_i32_0 : i32, i32, i32
  }
}

</mosaic_0001>

<bundles_post_ra>
// kernel: tpu_custom_call.1
= control target key start
LH: loop header
LB: loop body
LE: loop exit
PB: predicated region body
PF: predicated region fallthrough
CT: control target
= control target key end

     0   :  { %13 = vsyncpa [#allocation4], 0  ;;  %s3602_s0 = inlined_call_operand.hbm [shape: f32[4,8,128], index: 0, kind: input, shape index: {}]   ;;  %s3603_s1 = inlined_call_operand.hbm [shape: f32[4,8,128], index: 1, kind: input, shape index: {}]   ;;  %s3604_s2 = inlined_call_operand.hbm [shape: bf16[128,128], index: 2, kind: input, shape index: {}]   ;;  %s3605_s3 = inlined_call_operand.vmem [shape: f32[1,128], index: 3, kind: input, shape index: {}]   ;;  %s3606_s4 = inlined_call_operand.hbm [shape: bf16[128,256], index: 4, kind: input, shape index: {}]   ;;  %s3607_s5 = inlined_call_operand.vmem [shape: f32[1,256], index: 5, kind: input, shape index: {}]   ;;  %s3608_s6 = inlined_call_operand.hbm [shape: bf16[128,128], index: 6, kind: input, shape index: {}]   ;;  %s3609_s7 = inlined_call_operand.vmem [shape: f32[1,128], index: 7, kind: input, shape index: {}]   ;;  %s3610_s8 = inlined_call_operand.hbm [shape: f32[4,8,128], index: 8, kind: output, shape index: {}]  }
   0x1   :  { %14 = vsyncpa [#allocation7], 0 }
   0x2   :  { %15 = vsyncpa [#allocation10], 0 }
   0x3   :  { %16 = vsyncpa [#allocation5], 0  ;;  %s3127_s27 = smov [#allocation6]   ;;  %s3128_s29 = smov [#allocation9]  }
   0x4   :  { %s34_s28 = sshll.u32 %s3127_s27, 4  ;;  %s60_s30 = sshll.u32 %s3128_s29, 4  ;;  %s35_s28 = int_to_ptr.vmem [resolvable:$true] %s34_s28  ;;  %s61_s30 = int_to_ptr.vmem [resolvable:$true] %s60_s30 }
   0x5   :  { %s3007_s9 = scalar_lea.vmem %s35_s28, 512  ;;  %p3012_p1 = scmp.lt.s32.totalorder %s35_s28, %s35_s28 }
   0x6   :  { %p3008_p0 = scmp.ne.s32.totalorder %s35_s28, %s3007_s9  ;;  %p3013_p2 = scmp.lt.s32.totalorder %s3007_s9, %s3007_s9 }
   0x8   :  { %p3014_p3 = por %p3013_p2, %p3012_p1 }
   0xa   :  { %p3015_p4 = pnand %p3014_p3, %p3008_p0 }
   0xc   :  { %3018 = shalt.err (!%p3015_p4)
}
   0xd   :  { %s3129_s10 = smov 128   ;;  %s3130_s11 = smov 8  }
   0xe   :  { %40 = dma.hbm_to_vmem [thread:$0]  %s3603_s1, 512, %s35_s28, [#allocation7], %s3129_s10, %s3129_s10, %s3130_s11  }
   0xf   :  { %s3027_s14 = scalar_lea.vmem %s61_s30, 2048  ;;  %p3032_p6 = scmp.lt.s32.totalorder %s61_s30, %s61_s30 }
  0x10   :  { %p3028_p5 = scmp.ne.s32.totalorder %s61_s30, %s3027_s14  ;;  %p3033_p7 = scmp.lt.s32.totalorder %s3027_s14, %s3027_s14 }
  0x12   :  { %p3034_p8 = por %p3033_p7, %p3032_p6 }
  0x14   :  { %p3035_p9 = pnand %p3034_p8, %p3028_p5 }
  0x16   :  { %3038 = shalt.err (!%p3035_p9)
}
  0x17   :  { %66 = dma.hbm_to_vmem [thread:$0]  %s3606_s4, 2048, %s61_s30, [#allocation10], %s3129_s10, %s3129_s10, %s3130_s11  }
  0x18   :  { %s3131_s17 = smov [#allocation3]   ;;  %s3132_s19 = smov [#allocation8]  }
  0x19   :  { %s22_s18 = sshll.u32 %s3131_s17, 4  ;;  %s46_s20 = sshll.u32 %s3132_s19, 4  ;;  %s23_s18 = int_to_ptr.vmem [resolvable:$true] %s22_s18  ;;  %s47_s20 = int_to_ptr.vmem [resolvable:$true] %s46_s20 }
  0x1a   :  { %s3047_s1 = scalar_lea.vmem %s23_s18, 512  ;;  %p3052_p11 = scmp.lt.s32.totalorder %s23_s18, %s23_s18 }
  0x1b   :  { %p3048_p10 = scmp.ne.s32.totalorder %s23_s18, %s3047_s1  ;;  %p3053_p12 = scmp.lt.s32.totalorder %s3047_s1, %s3047_s1 }
  0x1d   :  { %p3054_p13 = por %p3053_p12, %p3052_p11 }
  0x1f   :  { %p3055_p0 = pnand %p3054_p13, %p3048_p10 }
  0x21   :  { %3058 = shalt.err (!%p3055_p0)
}
  0x22   :  { %28 = dma.hbm_to_vmem [thread:$0]  %s3602_s0, 512, %s23_s18, [#allocation4], %s3129_s10, %s3129_s10, %s3130_s11  }
  0x23   :  { %s3067_s4 = scalar_lea.vmem %s47_s20, 1024  ;;  %p3072_p2 = scmp.lt.s32.totalorder %s47_s20, %s47_s20 }
  0x24   :  { %p3068_p1 = scmp.ne.s32.totalorder %s47_s20, %s3067_s4  ;;  %p3073_p3 = scmp.lt.s32.totalorder %s3067_s4, %s3067_s4 }
  0x26   :  { %p3074_p4 = por %p3073_p3, %p3072_p2 }
  0x28   :  { %p3075_p5 = pnand %p3074_p4, %p3068_p1 }
  0x2a   :  { %3078 = shalt.err (!%p3075_p5)
}
  0x2b   :  { %s3133_s23 = smov 64   ;;  %s3134_s24 = smov 4  }
  0x2c   :  { %52 = dma.hbm_to_vmem [thread:$0]  %s3604_s2, 1024, %s47_s20, [#allocation7], %s3133_s23, %s3133_s23, %s3134_s24  }
  0x2d   :  { %s3135_s27 = smov [#allocation11]  }
  0x2e   :  { %s74_s28 = sshll.u32 %s3135_s27, 4  ;;  %s75_s28 = int_to_ptr.vmem [resolvable:$true] %s74_s28 }
  0x2f   :  { %s3087_s29 = scalar_lea.vmem %s75_s28, 1024  ;;  %p3092_p7 = scmp.lt.s32.totalorder %s75_s28, %s75_s28 }
  0x30   :  { %p3088_p6 = scmp.ne.s32.totalorder %s75_s28, %s3087_s29  ;;  %p3093_p8 = scmp.lt.s32.totalorder %s3087_s29, %s3087_s29 }
  0x32   :  { %p3094_p9 = por %p3093_p8, %p3092_p7 }
  0x34   :  { %p3095_p10 = pnand %p3094_p9, %p3088_p6 }
  0x36   :  { %3098 = shalt.err (!%p3095_p10)
}
  0x37   :  { %80 = dma.hbm_to_vmem [thread:$0]  %s3608_s6, 1024, %s75_s28, [#allocation10], %s3133_s23, %s3133_s23, %s3134_s24  }
  0x38   :  { %3119 = dma.done.wait [#allocation4], 512  }
  0x39   :  { %3120 = vsyncadd [#allocation4], 4294966784 }
  0x3a   :  { %3121 = dma.done.wait [#allocation7], 1536  }
  0x3b   :  { %3122 = vsyncadd [#allocation7], 4294965760 }
  0x3c   :  { %3123 = dma.done.wait [#allocation10], 3072  }
  0x3d   :  { %3124 = vsyncadd [#allocation10], 4294964224  ;;  %v3136_v0 = vmov 0   ;;  %v2893_v1 = vld [vmem:[#allocation8 + $0x38] sm:$0xff]   ;;  %v2897_v4 = vld [vmem:[#allocation8 + $0x30] sm:$0xff]   ;;  %v3137_v37 = vmov 0.0   ;;  %v249_v38 = vlaneseq }
  0x3e   :  { %371 = vmatprep.mubr.bf16.mxu1 %v3136_v0  ;;  %v2894_v2 = vld [vmem:[#allocation9 + $0x74] ss:$8 sps:$4 sm:$0xff]   ;;  %2646 = vmatprep.subr.bf16.mxu0 %v2893_v1  ;;  %v2896_v3 = vld [vmem:[#allocation9 + $0x70] ss:$8 sps:$4 sm:$0xff]   ;;  %v2898_v5 = vld [vmem:[#allocation9 + $0x64] ss:$8 sps:$4 sm:$0xff]  }
  0x3f   :  { %339 = vmatprep.subr.bf16.mxu1 %v2894_v2  ;;  %2647 = vmatpush3.bf16.msra.mxu0 %v2893_v1  ;;  %v2900_v6 = vld [vmem:[#allocation9 + $0x60] ss:$8 sps:$4 sm:$0xff]   ;;  %v2902_v8 = vld [vmem:[#allocation9 + $0x54] ss:$8 sps:$4 sm:$0xff]   ;;  %v2904_v9 = vld [vmem:[#allocation9 + $0x50] ss:$8 sps:$4 sm:$0xff]  }
  0x40   :  { %340 = vmatpush1.bf16.msra.mxu1 %v2896_v3  ;;  %2648 = vmatprep.subr.bf16.mxu0 %v2897_v4  ;;  %v2901_v7 = vld [vmem:[#allocation8 + $0x28] sm:$0xff]   ;;  %v2905_v10 = vld [vmem:[#allocation8 + $0x20] sm:$0xff]   ;;  %v2909_v13 = vld [vmem:[#allocation8 + $0x18] sm:$0xff]   ;;  %vm3138_vm0 = vmmov 0   ;;  %v250_v39 = vshrl.u32 %v249_v38, 7  ;;  %vm432_vm1 = vcmask 261120  }
  0x41   :  { %341 = vmatprep.subr.bf16.mxu1 %v2898_v5  ;;  %v2906_v11 = vld [vmem:[#allocation9 + $0x44] ss:$8 sps:$4 sm:$0xff]   ;;  %v2908_v12 = vld [vmem:[#allocation9 + $0x40] ss:$8 sps:$4 sm:$0xff]   ;;  %v2910_v14 = vld [vmem:[#allocation9 + $0x34] ss:$8 sps:$4 sm:$0xff]  }
  0x42   :  { %v2912_v15 = vld [vmem:[#allocation9 + $0x30] ss:$8 sps:$4 sm:$0xff]   ;;  %v2914_v17 = vld [vmem:[#allocation9 + $0x24] ss:$8 sps:$4 sm:$0xff]   ;;  %v2916_v20 = vld [vmem:[#allocation9 + $0x20] ss:$8 sps:$4 sm:$0xff]  }
  0x43   :  { %2649 = vmatpush3.bf16.msra.mxu0 %v2897_v4  ;;  %v2913_v16 = vld [vmem:[#allocation8 + $0x10] sm:$0xff]   ;;  %v99_v18 = vld [vmem:[#allocation3] sm:$0xff]  ;;  %v100_v19 = vld [vmem:[#allocation3 + $0x8] sm:$0xff]  ;;  %v251_v40 = vsub.s32 0, %v250_v39  ;;  %v255_v42 = vsub.s32 1, %v250_v39  ;;  %vm669_vm2 = vcmask 1043456  }
  0x44   :  { %342 = vmatpush1.bf16.msra.mxu1 %v2900_v6  ;;  %2650 = vmatprep.subr.bf16.mxu0 %v2901_v7  ;;  %v2917_v21 = vld [vmem:[#allocation8 + $0x8] sm:$0xff]   ;;  %v103_v22 = vpack.c.bf16 %v100_v19, %v99_v18  ;;  %v2918_v23 = vld [vmem:[#allocation9 + $0x14] ss:$8 sps:$4 sm:$0xff]   ;;  %v2920_v24 = vld [vmem:[#allocation9 + $0x10] ss:$8 sps:$4 sm:$0xff]   ;;  %vm617_vm3 = vcmask 64512  }
  0x45   :  { %343 = vmatprep.subr.bf16.mxu1 %v2902_v8  ;;  %v2921_v25 = vld [vmem:[#allocation8] sm:$0xff]   ;;  %v101_v27 = vld [vmem:[#allocation3 + $0x10] sm:$0xff]  ;;  %v102_v28 = vld [vmem:[#allocation3 + $0x18] sm:$0xff]  ;;  %vm867_vm4 = vcmask 257024   ;;  %vm1336_vm5 = vcmask 519424   ;;  %vm1805_vm6 = vcmask 781824  }
  0x46   :  { %2662 = vmatprep.mubr.bf16.mxu0 %v103_v22  ;;  %v2922_v26 = vld [vmem:[#allocation9 + $0x4] ss:$8 sps:$4 sm:$0xff]   ;;  %v2924_v29 = vld [vmem:[#allocation9] ss:$8 sps:$4 sm:$0xff]   ;;  %v104_v32 = vpack.c.bf16 %v102_v28, %v101_v27  ;;  %v107_v34 = vld [vmem:[#allocation6 + $0x10] sm:$0xff]  ;;  %vm2274_vm7 = vcmask 1044224  }
  0x47   :  { %2651 = vmatpush3.bf16.msra.mxu0 %v2901_v7  ;;  %v105_v30 = vld [vmem:[#allocation6] sm:$0xff]  ;;  %v106_v31 = vld [vmem:[#allocation6 + $0x8] sm:$0xff]  ;;  %v108_v35 = vld [vmem:[#allocation6 + $0x18] sm:$0xff]  ;;  %s3141_s15 = smov [#allocation12]  }
  0x48   :  { %344 = vmatpush1.bf16.msra.mxu1 %v2904_v9  ;;  %2652 = vmatprep.subr.bf16.mxu0 %v2905_v10  ;;  %v109_v33 = vpack.c.bf16 %v106_v31, %v105_v30  ;;  %v110_v36 = vpack.c.bf16 %v108_v35, %v107_v34  ;;  %v247_v41 = vld [vmem:[%s3607_s5] sm:$0x3]  ;;  %s3140_s5 = smov 32   ;;  %s2424_s16 = sshll.u32 %s3141_s15, 4  ;;  %s2425_s16 = int_to_ptr.vmem [resolvable:$true] %s2424_s16 }
  0x49   :  { %345 = vmatprep.subr.bf16.mxu1 %v2906_v11  ;;  %v252_v43 = vrot.slane %v247_v41, %v251_v40  ;;  %v3226_v45 = vrot.slane %v247_v41, %v255_v42  ;;  %v2438_v46 = vld [vmem:[%s3605_s3] ss:$0 sm:$0xff]  ;;  %s3139_s3 = smov 96   ;;  %s3099_s17 = scalar_lea.vmem %s2425_s16, 512 }
  0x4a   :  { %p3100_p11 = scmp.ne.s32.totalorder %s2425_s16, %s3099_s17  ;;  %p3104_p12 = scmp.lt.s32.totalorder %s2425_s16, %s2425_s16 }
  0x4b   :  { %2653 = vmatpush3.bf16.msra.mxu0 %v2905_v10  ;;  %p3105_p13 = scmp.lt.s32.totalorder %s3099_s17, %s3099_s17 }
  0x4c   :  { %346 = vmatpush1.bf16.msra.mxu1 %v2908_v12  ;;  %2654 = vmatprep.subr.bf16.mxu0 %v2909_v13 }
  0x4d   :  { %347 = vmatprep.subr.bf16.mxu1 %v2910_v14  ;;  %p3106_p0 = por %p3105_p13, %p3104_p12 }
  0x4f   :  { %2655 = vmatpush3.bf16.msra.mxu0 %v2909_v13  ;;  %p3107_p1 = pnand %p3106_p0, %p3100_p11 }
  0x50   :  { %348 = vmatpush1.bf16.msra.mxu1 %v2912_v15  ;;  %2656 = vmatprep.subr.bf16.mxu0 %v2913_v16 }
  0x51   :  { %349 = vmatprep.subr.bf16.mxu1 %v2914_v17 }
  0x53   :  { %2657 = vmatpush3.bf16.msra.mxu0 %v2913_v16 }
  0x54   :  { %350 = vmatpush1.bf16.msra.mxu1 %v2916_v20  ;;  %2658 = vmatprep.subr.bf16.mxu0 %v2917_v21 }
  0x55   :  { %351 = vmatprep.subr.bf16.mxu1 %v2918_v23 }
  0x57   :  { %2659 = vmatpush3.bf16.msra.mxu0 %v2917_v21 }
  0x58   :  { %352 = vmatpush1.bf16.msra.mxu1 %v2920_v24  ;;  %2660 = vmatprep.subr.bf16.mxu0 %v2921_v25 }
  0x59   :  { %353 = vmatprep.subr.bf16.mxu1 %v2922_v26 }
  0x5b   :  { %2661 = vmatpush3.bf16.msra.mxu0 %v2921_v25 }
  0x5c   :  { %354 = vmatpush1.bf16.msra.mxu1 %v2924_v29  ;;  %2666 = vmatprep.subr.bf16.mxu0 %v3137_v37 }
  0x5d   :  { %2690 = vmatprep.subr.bf16.mxu1 %v3137_v37 }
  0x5e   :  { %2663 = vmatmul.mubr.bf16.vlgmr.msra.gmra.mxu0 %v104_v32 }
  0x5f   :  { %372 = vmatmul.mubr.bf16.vlgmr.msra.gmra.mxu1 %v109_v33  ;;  %2668 = vmatprep.mubr.msk.bf16.mxu0 %vm3138_vm0, %v3137_v37 }
  0x60   :  { %381 = vmatprep.mubr.bf16.mxu1 %v3136_v0 }
  0x67   :  { %382 = vmatmul.mubr.bf16.gmra.mxu1 %v110_v36 }
  0x68   :  { %2692 = vmatprep.mubr.msk.bf16.mxu1 %vm3138_vm0, %v3137_v37 }
 0x11e   :  { %v2664_v44 = vpop.f32.mrf.mxu0 }
 0x11f   :  { %v373_v47 = vpop.f32.mrf.mxu1  ;;  %v225_v10 = vadd.f32 %v2664_v44, %v2438_v46 }
 0x120   :  { %v374_v48 = vadd.f32 %v373_v47, %v252_v43  ;;  %v216_v49 = vpop.f32.mrf.mxu0 }
 0x121   :  { %v375_v50 = vpop.f32.mrf.mxu1  ;;  %v217_v52 = vadd.f32 %v2438_v46, %v216_v49  ;;  %v394_v14 = vmul.f32 0.17677669, %v225_v10 }
 0x122   :  { %v3231_v51 = vpack.c.bf16 %v374_v48, %v374_v48  ;;  %v376_v53 = vadd.f32 %v375_v50, %v3226_v45  ;;  %v2665_v54 = vpop.f32.mrf.mxu0 }
 0x123   :  { %v377_v55 = vpop.f32.mrf.mxu1  ;;  %v392_v60 = vmul.f32 0.17677669, %v217_v52  ;;  %v3269_v16 = vpack.c.bf16 %v394_v14, %v394_v14  ;;  %v228_v17 = vadd.f32 %v2665_v54, %v2438_v46 }
 0x124   :  { %v3234_v56 = vpack.c.bf16 %v376_v53, %v376_v53  ;;  %v378_v57 = vadd.f32 %v377_v55, %v252_v43  ;;  %v437_v58 = vsel %vm432_vm1, %v3231_v51, 0  ;;  %v219_v62 = vpop.f32.mrf.mxu0 }
 0x125   :  { %v379_v59 = vpop.f32.mrf.mxu1  ;;  %2667 = vmatpush3.bf16.xpose.msra.mxu0 %v437_v58  ;;  %v3244_v2 = vpack.c.bf16 %v392_v60, %v392_v60  ;;  %v220_v3 = vadd.f32 %v2438_v46, %v219_v62  ;;  %v395_v20 = vmul.f32 0.17677669, %v228_v17 }
 0x126   :  { %v671_v61 = vsel %vm669_vm2, %v3234_v56, 0  ;;  %2672 = vmatprep.subr.bf16.mxu0 %v3137_v37  ;;  %v3241_v0 = vpack.c.bf16 %v378_v57, %v378_v57  ;;  %v380_v19 = vadd.f32 %v379_v59, %v3226_v45 }
 0x127   :  { %2691 = vmatpush3.bf16.msra.mxu1 %v671_v61  ;;  %v383_v63 = vpop.f32.mrf.mxu1  ;;  %v393_v7 = vmul.f32 0.17677669, %v220_v3  ;;  %v3281_v22 = vpack.c.bf16 %v395_v20, %v395_v20 }
 0x128   :  { %2702 = vmatprep.subr.bf16.mxu1 %v3137_v37  ;;  %v384_v4 = vadd.f32 %v383_v63, %v252_v43  ;;  %v483_v6 = vsel %vm432_vm1, %v3241_v0, 0  ;;  %v3279_v21 = vpack.c.bf16 %v380_v19, %v380_v19 }
 0x129   :  { %v385_v1 = vpop.f32.mrf.mxu1  ;;  %v3258_v11 = vpack.c.bf16 %v393_v7, %v393_v7 }
 0x12a   :  { %v3247_v5 = vadd.f32 %v385_v1, %v3226_v45  ;;  %v3255_v8 = vpack.c.bf16 %v384_v4, %v384_v4  ;;  %v717_v23 = vsel %vm669_vm2, %v3279_v21, 0 }
 0x12b   :  { %v387_v9 = vpop.f32.mrf.mxu1 }
 0x12c   :  { %2669 = vmatmul.mubr.msk.bf16.vlgmr.msra.gmra.mxu0 %vm432_vm1, %v3244_v2  ;;  %v529_v12 = vsel %vm432_vm1, %v3255_v8, 0  ;;  %v388_v13 = vadd.f32 %v387_v9, %v252_v43 }
 0x12d   :  { %2673 = vmatpush3.bf16.xpose.msra.mxu0 %v483_v6  ;;  %2674 = vmatprep.mubr.msk.bf16.mxu0 %vm3138_vm0, %v3137_v37  ;;  %v389_v14 = vpop.f32.mrf.mxu1 }
 0x12e   :  { %2678 = vmatprep.subr.bf16.mxu0 %v3137_v37  ;;  %v3266_v15 = vpack.c.bf16 %v388_v13, %v388_v13  ;;  %v390_v19 = vadd.f32 %v389_v14, %v3226_v45 }
 0x130   :  { %v575_v18 = vsel %vm432_vm1, %v3266_v15, 0 }
 0x134   :  { %2675 = vmatmul.mubr.msk.bf16.vlgmr.msra.gmra.mxu0 %vm432_vm1, %v3258_v11 }
 0x135   :  { %2679 = vmatpush3.bf16.xpose.msra.mxu0 %v529_v12  ;;  %2680 = vmatprep.mubr.msk.bf16.mxu0 %vm3138_vm0, %v3137_v37  ;;  %v3316_v12 = vpack.c.bf16 %v3247_v5, %v3247_v5 }
 0x136   :  { %2684 = vmatprep.subr.bf16.mxu0 %v3137_v37 }
 0x137   :  { %v763_v20 = vsel %vm669_vm2, %v3316_v12, 0 }
 0x13c   :  { %2681 = vmatmul.mubr.msk.bf16.vlgmr.msra.gmra.mxu0 %vm432_vm1, %v3269_v16 }
 0x13d   :  { %2685 = vmatpush3.bf16.xpose.msra.mxu0 %v575_v18  ;;  %2686 = vmatprep.mubr.msk.bf16.mxu0 %vm3138_vm0, %v3137_v37 }
 0x13e   :  { %2696 = vmatprep.subr.bf16.mxu0 %v3137_v37 }
 0x144   :  { %2687 = vmatmul.mubr.msk.bf16.vlgmr.msra.gmra.mxu0 %vm432_vm1, %v3281_v22 }
 0x145   :  { %2697 = vmatpush3.bf16.msra.mxu0 %v717_v23  ;;  %2698 = vmatprep.mubr.msk.bf16.mxu0 %vm3138_vm0, %v3137_v37  ;;  %v3325_v23 = vpack.c.bf16 %v390_v19, %v390_v19 }
 0x146   :  { %2708 = vmatprep.subr.bf16.mxu0 %v3137_v37 }
 0x147   :  { %v809_v45 = vsel %vm669_vm2, %v3325_v23, 0 }
 0x1ec   :  { %v473_v24 = vpop.f32.mrf.mxu0 }
 0x1ed   :  { %v618_v25 = vsel %vm617_vm3, %v473_v24, -inf }
 0x1ee   :  { %619 = vmax.xlane.f32.xlu0 %v618_v25  ;;  %v2670_v26 = vpop.f32.mrf.mxu0 }
 0x1f0   :  { %v476_v27 = vpop.f32.mrf.mxu0 }
 0x1f2   :  { %v2671_v28 = vpop.f32.mrf.mxu0 }
 0x1f4   :  { %v519_v29 = vpop.f32.mrf.mxu0 }
 0x1f5   :  { %v621_v30 = vsel %vm617_vm3, %v519_v29, -inf }
 0x1f6   :  { %622 = vmax.xlane.f32.xlu0 %v621_v30  ;;  %v2676_v31 = vpop.f32.mrf.mxu0 }
 0x1f8   :  { %v522_v32 = vpop.f32.mrf.mxu0 }
 0x1fa   :  { %v2677_v33 = vpop.f32.mrf.mxu0 }
 0x1fc   :  { %v565_v34 = vpop.f32.mrf.mxu0 }
 0x1fd   :  { %v624_v35 = vsel %vm617_vm3, %v565_v34, -inf }
 0x1fe   :  { %625 = vmax.xlane.f32.xlu1 %v624_v35  ;;  %v2682_v36 = vpop.f32.mrf.mxu0 }
 0x200   :  { %v568_v38 = vpop.f32.mrf.mxu0 }
 0x202   :  { %v2683_v39 = vpop.f32.mrf.mxu0 }
 0x204   :  { %v611_v40 = vpop.f32.mrf.mxu0 }
 0x205   :  { %v627_v41 = vsel %vm617_vm3, %v611_v40, -inf }
 0x206   :  { %628 = vmax.xlane.f32.xlu1 %v627_v41  ;;  %v2688_v42 = vpop.f32.mrf.mxu0 }
 0x208   :  { %v614_v43 = vpop.f32.mrf.mxu0 }
 0x20a   :  { %v2689_v44 = vpop.f32.mrf.mxu0 }
 0x277   :  { %v620_v46 = vpop.xlane.xlu0 %619 }
 0x278   :  { %v630_v47 = vsub.f32 %v473_v24, %v620_v46 }
 0x27a   :  { %v634_v48 = vmul.f32 1.442695, %v630_v47 }
 0x27c   :  { %2935 = vpow2.f32 %v634_v48 }
 0x27f   :  { %v623_v49 = vpop.xlane.xlu0 %622 }
 0x280   :  { %v631_v50 = vsub.f32 %v519_v29, %v623_v49 }
 0x282   :  { %v636_v52 = vmul.f32 1.442695, %v631_v50 }
 0x284   :  { %2937 = vpow2.f32 %v636_v52 }
 0x287   :  { %v626_v53 = vpop.xlane.xlu1 %625 }
 0x288   :  { %v632_v54 = vsub.f32 %v565_v34, %v626_v53 }
 0x289   :  { %v2936_v55 = vpop.eup %2935 }
 0x28a   :  { %v638_v57 = vmul.f32 1.442695, %v632_v54  ;;  %v642_v58 = vsel %vm617_vm3, %v2936_v55, 0.0 }
 0x28b   :  { %643 = vadd.xlane.f32.xlu0 %v642_v58 }
 0x28c   :  { %2939 = vpow2.f32 %v638_v57 }
 0x28f   :  { %v629_v63 = vpop.xlane.xlu1 %628 }
 0x290   :  { %v633_v1 = vsub.f32 %v611_v40, %v629_v63 }
 0x291   :  { %v2938_v59 = vpop.eup %2937 }
 0x292   :  { %v645_v60 = vsel %vm617_vm3, %v2938_v59, 0.0  ;;  %v640_v3 = vmul.f32 1.442695, %v633_v1 }
 0x293   :  { %646 = vadd.xlane.f32.xlu1 %v645_v60 }
 0x294   :  { %2941 = vpow2.f32 %v640_v3 }
 0x299   :  { %v2940_v61 = vpop.eup %2939 }
 0x29a   :  { %v648_v62 = vsel %vm617_vm3, %v2940_v61, 0.0 }
 0x29b   :  { %649 = vadd.xlane.f32.xlu0 %v648_v62 }
 0x2a1   :  { %v2942_v4 = vpop.eup %2941 }
 0x2a2   :  { %v651_v6 = vsel %vm617_vm3, %v2942_v4, 0.0 }
 0x2a4   :  { %924 = vrot.lane.b32.xlu1 %v3241_v0, %s3139_s3 }
 0x2a8   :  { %872 = vrot.lane.b32.xlu1 %v3244_v2, %s3139_s3 }
 0x2b1   :  { %874 = vrot.lane.b32.xlu0 %v3231_v51, %s3139_s3 }
 0x2b5   :  { %974 = vrot.lane.b32.xlu0 %v3255_v8, %s3139_s3 }
 0x2b9   :  { %972 = vrot.lane.b32.xlu0 %v3269_v16, %s3139_s3 }
 0x2cc   :  { %652 = vadd.xlane.f32.xlu1 %v651_v6 }
 0x2dd   :  { %922 = vrot.lane.b32.xlu1 %v3258_v11, %s3139_s3 }
 0x2e1   :  { %1024 = vrot.lane.b32.xlu1 %v3266_v15, %s3139_s3 }
 0x2e5   :  { %1022 = vrot.lane.b32.xlu1 %v3281_v22, %s3139_s3 }
 0x314   :  { %v644_v7 = vpop.xlane.xlu0 %643 }
 0x315   :  { %2943 = vrcp.f32 %v644_v7 }
 0x31c   :  { %v647_v9 = vpop.xlane.xlu1 %646 }
 0x31d   :  { %2945 = vrcp.f32 %v647_v9 }
 0x320   :  { %v925_v31 = vpop.permute.xlu1 %924 }
 0x321   :  { %v930_v42 = vsel %vm432_vm1, %v925_v31, 0 }
 0x322   :  { %v2944_v10 = vpop.eup %2943 }
 0x323   :  { %v658_v13 = vmul.f32 %v2944_v10, %v2936_v55 }
 0x324   :  { %v650_v17 = vpop.xlane.xlu0 %649  ;;  %v873_v33 = vpop.permute.xlu1 %872 }
 0x325   :  { %v662_v18 = vpack.c.bf16 %v658_v13, %v658_v13  ;;  %2947 = vrcp.f32 %v650_v17 }
 0x327   :  { %2693 = vmatmul.mubr.msk.bf16.vlgmr.msra.gmra.mxu1 %vm617_vm3, %v662_v18 }
 0x328   :  { %2703 = vmatpush3.bf16.msra.mxu1 %v763_v20  ;;  %2704 = vmatprep.mubr.msk.bf16.mxu1 %vm3138_vm0, %v3137_v37  ;;  %v875_v28 = vpop.permute.xlu0 %874 }
 0x329   :  { %2714 = vmatprep.subr.bf16.mxu1 %v3137_v37  ;;  %v880_v30 = vsel %vm432_vm1, %v875_v28, 0 }
 0x32a   :  { %v2946_v5 = vpop.eup %2945 }
 0x32b   :  { %v659_v24 = vmul.f32 %v2946_v5, %v2938_v59 }
 0x32c   :  { %v975_v32 = vpop.permute.xlu0 %974 }
 0x32d   :  { %v663_v25 = vpack.c.bf16 %v659_v24, %v659_v24  ;;  %v980_v34 = vsel %vm432_vm1, %v975_v32, 0 }
 0x32f   :  { %2699 = vmatmul.mubr.msk.bf16.vlgmr.msra.gmra.mxu0 %vm617_vm3, %v663_v25 }
 0x330   :  { %2709 = vmatpush3.bf16.msra.mxu0 %v809_v45  ;;  %2710 = vmatprep.mubr.msk.bf16.mxu0 %vm3138_vm0, %v3137_v37  ;;  %v973_v35 = vpop.permute.xlu0 %972 }
 0x331   :  { %2720 = vmatprep.subr.bf16.mxu0 %v3137_v37 }
 0x332   :  { %v2948_v26 = vpop.eup %2947 }
 0x333   :  { %v660_v27 = vmul.f32 %v2948_v26, %v2940_v61 }
 0x335   :  { %v664_v29 = vpack.c.bf16 %v660_v27, %v660_v27 }
 0x337   :  { %2705 = vmatmul.mubr.msk.bf16.vlgmr.msra.gmra.mxu1 %vm617_vm3, %v664_v29 }
 0x338   :  { %2715 = vmatpush3.bf16.xpose.msra.mxu1 %v880_v30  ;;  %2716 = vmatprep.mubr.msk.bf16.mxu1 %vm3138_vm0, %v3137_v37 }
 0x339   :  { %2726 = vmatprep.subr.bf16.mxu1 %v3137_v37 }
 0x33f   :  { %2717 = vmatmul.mubr.msk.bf16.vlgmr.msra.gmra.mxu1 %vm432_vm1, %v873_v33 }
 0x340   :  { %2727 = vmatpush3.bf16.xpose.msra.mxu1 %v980_v34  ;;  %2728 = vmatprep.mubr.msk.bf16.mxu1 %vm3138_vm0, %v3137_v37 }
 0x341   :  { %2738 = vmatprep.subr.bf16.mxu1 %v3137_v37 }
 0x347   :  { %2729 = vmatmul.mubr.msk.bf16.vlgmr.msra.gmra.mxu1 %vm432_vm1, %v973_v35 }
 0x348   :  { %2740 = vmatprep.mubr.msk.bf16.mxu1 %vm3138_vm0, %v3137_v37 }
 0x355   :  { %v653_v36 = vpop.xlane.xlu1 %652 }
 0x356   :  { %2949 = vrcp.f32 %v653_v36 }
 0x359   :  { %v923_v41 = vpop.permute.xlu1 %922 }
 0x35d   :  { %v1025_v43 = vpop.permute.xlu1 %1024 }
 0x35e   :  { %v1030_v44 = vsel %vm432_vm1, %v1025_v43, 0 }
 0x361   :  { %v1023_v46 = vpop.permute.xlu1 %1022 }
 0x363   :  { %v2950_v38 = vpop.eup %2949 }
 0x364   :  { %v661_v39 = vmul.f32 %v2950_v38, %v2942_v4 }
 0x366   :  { %v665_v40 = vpack.c.bf16 %v661_v39, %v661_v39 }
 0x368   :  { %2711 = vmatmul.mubr.msk.bf16.vlgmr.msra.gmra.mxu0 %vm617_vm3, %v665_v40 }
 0x369   :  { %2721 = vmatpush3.bf16.xpose.msra.mxu0 %v930_v42  ;;  %2722 = vmatprep.mubr.msk.bf16.mxu0 %vm3138_vm0, %v3137_v37 }
 0x36a   :  { %2732 = vmatprep.subr.bf16.mxu0 %v3137_v37 }
 0x370   :  { %2723 = vmatmul.mubr.msk.bf16.vlgmr.msra.gmra.mxu0 %vm432_vm1, %v923_v41 }
 0x371   :  { %2733 = vmatpush3.bf16.xpose.msra.mxu0 %v1030_v44  ;;  %2734 = vmatprep.mubr.msk.bf16.mxu0 %vm3138_vm0, %v3137_v37 }
 0x372   :  { %2744 = vmatprep.subr.bf16.mxu0 %v3137_v37 }
 0x378   :  { %2735 = vmatmul.mubr.msk.bf16.vlgmr.msra.gmra.mxu0 %vm432_vm1, %v1023_v46 }
 0x379   :  { %2746 = vmatprep.mubr.msk.bf16.mxu0 %vm3138_vm0, %v3137_v37 }
 0x3e7   :  { %v707_v47 = vpop.f32.mrf.mxu1 }
 0x3e8   :  { %v2546_v48 = vpack.c.bf16 %v707_v47, %v707_v47 }
 0x3e9   :  { %v2694_v49 = vpop.f32.mrf.mxu1 }
 0x3ea   :  { %868 = vst.msk [vmem:[#allocation2] sm:$0xf] %vm867_vm4, %v2546_v48 }
 0x3eb   :  { %v710_v50 = vpop.f32.mrf.mxu1 }
 0x3ed   :  { %v2695_v52 = vpop.f32.mrf.mxu1 }
 0x3ef   :  { %v753_v53 = vpop.f32.mrf.mxu0 }
 0x3f0   :  { %v2547_v54 = vpack.c.bf16 %v753_v53, %v753_v53 }
 0x3f1   :  { %v2700_v55 = vpop.f32.mrf.mxu0 }
 0x3f2   :  { %869 = vst.msk [vmem:[#allocation2 + $0x4] sm:$0xf] %vm867_vm4, %v2547_v54 }
 0x3f3   :  { %v756_v57 = vpop.f32.mrf.mxu0 }
 0x3f5   :  { %v2701_v58 = vpop.f32.mrf.mxu0 }
 0x3f7   :  { %v799_v59 = vpop.f32.mrf.mxu1 }
 0x3f8   :  { %v2548_v60 = vpack.c.bf16 %v799_v59, %v799_v59 }
 0x3f9   :  { %v2706_v61 = vpop.f32.mrf.mxu1 }
 0x3fa   :  { %870 = vst.msk [vmem:[#allocation2 + $0x8] sm:$0xf] %vm867_vm4, %v2548_v60 }
 0x3fb   :  { %v802_v62 = vpop.f32.mrf.mxu1 }
 0x3fd   :  { %v2707_v63 = vpop.f32.mrf.mxu1 }
 0x3ff   :  { %v916_v1 = vpop.f32.mrf.mxu1 }
 0x400   :  { %v1072_v3 = vsel %vm617_vm3, %v916_v1, -inf }
 0x401   :  { %1073 = vmax.xlane.f32.xlu0 %v1072_v3  ;;  %v2718_v4 = vpop.f32.mrf.mxu1 }
 0x403   :  { %v919_v6 = vpop.f32.mrf.mxu1 }
 0x405   :  { %v2719_v7 = vpop.f32.mrf.mxu1 }
 0x407   :  { %v1016_v9 = vpop.f32.mrf.mxu1 }
 0x408   :  { %v1078_v10 = vsel %vm617_vm3, %v1016_v9, -inf }
 0x409   :  { %1079 = vmax.xlane.f32.xlu0 %v1078_v10  ;;  %v2730_v13 = vpop.f32.mrf.mxu1 }
 0x40b   :  { %v1019_v14 = vpop.f32.mrf.mxu1 }
 0x40d   :  { %v2731_v17 = vpop.f32.mrf.mxu1 }
 0x428   :  { %v845_v18 = vpop.f32.mrf.mxu0 }
 0x429   :  { %v2549_v19 = vpack.c.bf16 %v845_v18, %v845_v18 }
 0x42a   :  { %v2712_v20 = vpop.f32.mrf.mxu0 }
 0x42b   :  { %871 = vst.msk [vmem:[#allocation2 + $0xc] sm:$0xf] %vm867_vm4, %v2549_v19 }
 0x42c   :  { %v848_v5 = vpop.f32.mrf.mxu0 }
 0x42e   :  { %v2713_v24 = vpop.f32.mrf.mxu0 }
 0x430   :  { %v966_v25 = vpop.f32.mrf.mxu0 }
 0x431   :  { %v1075_v45 = vsel %vm617_vm3, %v966_v25, -inf }
 0x432   :  { %1076 = vmax.xlane.f32.xlu1 %v1075_v45  ;;  %v2724_v26 = vpop.f32.mrf.mxu0 }
 0x434   :  { %v969_v27 = vpop.f32.mrf.mxu0 }
 0x436   :  { %v2725_v28 = vpop.f32.mrf.mxu0 }
 0x438   :  { %v1066_v29 = vpop.f32.mrf.mxu0 }
 0x439   :  { %v1081_v30 = vsel %vm617_vm3, %v1066_v29, -inf }
 0x43a   :  { %1082 = vmax.xlane.f32.xlu0 %v1081_v30  ;;  %v2736_v31 = vpop.f32.mrf.mxu0 }
 0x43c   :  { %v1069_v32 = vpop.f32.mrf.mxu0 }
 0x43e   :  { %v2737_v33 = vpop.f32.mrf.mxu0 }
 0x443   :  { %1168 = vrot.lane.b32.xlu1 %v3279_v21, %s3139_s3 }
 0x447   :  { %1216 = vrot.lane.b32.xlu1 %v3316_v12, %s3139_s3 }
 0x44b   :  { %1264 = vrot.lane.b32.xlu1 %v3325_v23, %s3139_s3 }
 0x48a   :  { %v1074_v34 = vpop.xlane.xlu0 %1073 }
 0x48b   :  { %v1084_v35 = vsub.f32 %v916_v1, %v1074_v34 }
 0x48d   :  { %v1088_v36 = vmul.f32 1.442695, %v1084_v35 }
 0x48f   :  { %2951 = vpow2.f32 %v1088_v36 }
 0x492   :  { %v1080_v40 = vpop.xlane.xlu0 %1079 }
 0x493   :  { %v1086_v41 = vsub.f32 %v1016_v9, %v1080_v40 }
 0x495   :  { %v1092_v44 = vmul.f32 1.442695, %v1086_v41 }
 0x49c   :  { %v2952_v38 = vpop.eup %2951 }
 0x49d   :  { %v1096_v39 = vsel %vm617_vm3, %v2952_v38, 0.0 }
 0x49e   :  { %1097 = vadd.xlane.f32.xlu0 %v1096_v39 }
 0x4b4   :  { %1120 = vrot.lane.b32.xlu0 %v3234_v56, %s3139_s3 }
 0x4bb   :  { %v1077_v42 = vpop.xlane.xlu1 %1076 }
 0x4bc   :  { %v1085_v43 = vsub.f32 %v966_v25, %v1077_v42 }
 0x4be   :  { %v1090_v46 = vmul.f32 1.442695, %v1085_v43 }
 0x4bf   :  { %v1169_v47 = vpop.permute.xlu1 %1168 }
 0x4c0   :  { %2953 = vpow2.f32 %v1090_v46  ;;  %v1174_v48 = vsel %vm669_vm2, %v1169_v47, 0 }
 0x4c1   :  { %2745 = vmatpush3.bf16.msra.mxu0 %v1174_v48  ;;  %2955 = vpow2.f32 %v1092_v44 }
 0x4c2   :  { %2756 = vmatprep.subr.bf16.mxu0 %v3137_v37 }
 0x4c3   :  { %v1083_v54 = vpop.xlane.xlu0 %1082  ;;  %v1217_v3 = vpop.permute.xlu1 %1216 }
 0x4c4   :  { %v1087_v55 = vsub.f32 %v1066_v29, %v1083_v54  ;;  %v1222_v6 = vsel %vm669_vm2, %v1217_v3, 0 }
 0x4c6   :  { %v1094_v57 = vmul.f32 1.442695, %v1087_v55 }
 0x4c7   :  { %v1265_v7 = vpop.permute.xlu1 %1264 }
 0x4c8   :  { %2957 = vpow2.f32 %v1094_v57  ;;  %v1270_v20 = vsel %vm669_vm2, %v1265_v7, 0 }
 0x4cd   :  { %v2954_v49 = vpop.eup %2953 }
 0x4ce   :  { %v1099_v50 = vsel %vm617_vm3, %v2954_v49, 0.0  ;;  %v2956_v52 = vpop.eup %2955 }
 0x4cf   :  { %1100 = vadd.xlane.f32.xlu1 %v1099_v50  ;;  %v1102_v53 = vsel %vm617_vm3, %v2956_v52, 0.0 }
 0x4d3   :  { %1103 = vadd.xlane.f32.xlu0 %v1102_v53 }
 0x4d5   :  { %v2958_v58 = vpop.eup %2957 }
 0x4d6   :  { %v1105_v59 = vsel %vm617_vm3, %v2958_v58, 0.0 }
 0x4e0   :  { %1393 = vrot.lane.b32.xlu1 %v3241_v0, %s3133_s23 }
 0x4e9   :  { %1343 = vrot.lane.b32.xlu0 %v3231_v51, %s3133_s23 }
 0x4ed   :  { %1341 = vrot.lane.b32.xlu0 %v3244_v2, %s3133_s23 }
 0x4f1   :  { %1443 = vrot.lane.b32.xlu0 %v3255_v8, %s3133_s23 }
 0x4f5   :  { %1441 = vrot.lane.b32.xlu0 %v3269_v16, %s3133_s23 }
 0x504   :  { %1106 = vadd.xlane.f32.xlu1 %v1105_v59 }
 0x515   :  { %1391 = vrot.lane.b32.xlu1 %v3258_v11, %s3133_s23 }
 0x519   :  { %1493 = vrot.lane.b32.xlu1 %v3266_v15, %s3133_s23 }
 0x51d   :  { %1491 = vrot.lane.b32.xlu1 %v3281_v22, %s3133_s23 }
 0x527   :  { %v1098_v60 = vpop.xlane.xlu0 %1097 }
 0x528   :  { %2959 = vrcp.f32 %v1098_v60 }
 0x52b   :  { %v1121_v61 = vpop.permute.xlu0 %1120 }
 0x52c   :  { %v1126_v62 = vsel %vm669_vm2, %v1121_v61, 0 }
 0x52d   :  { %2739 = vmatpush3.bf16.msra.mxu1 %v1126_v62 }
 0x52e   :  { %2750 = vmatprep.subr.bf16.mxu1 %v3137_v37 }
 0x535   :  { %v2960_v63 = vpop.eup %2959 }
 0x536   :  { %v1112_v1 = vmul.f32 %v2960_v63, %v2952_v38 }
 0x538   :  { %v1116_v4 = vpack.c.bf16 %v1112_v1, %v1112_v1 }
 0x53a   :  { %2741 = vmatmul.mubr.msk.bf16.vlgmr.msra.gmra.mxu1 %vm617_vm3, %v1116_v4 }
 0x53b   :  { %2751 = vmatpush3.bf16.msra.mxu1 %v1222_v6  ;;  %2752 = vmatprep.mubr.msk.bf16.mxu1 %vm3138_vm0, %v3137_v37 }
 0x53c   :  { %2762 = vmatprep.subr.bf16.mxu1 %v3137_v37 }
 0x558   :  { %v1101_v9 = vpop.xlane.xlu1 %1100 }
 0x559   :  { %2961 = vrcp.f32 %v1101_v9 }
 0x55c   :  { %v1104_v10 = vpop.xlane.xlu0 %1103  ;;  %v1394_v29 = vpop.permute.xlu1 %1393 }
 0x55d   :  { %2963 = vrcp.f32 %v1104_v10  ;;  %v1399_v35 = vsel %vm432_vm1, %v1394_v29, 0 }
 0x560   :  { %v1344_v17 = vpop.permute.xlu0 %1343 }
 0x561   :  { %v1349_v45 = vsel %vm432_vm1, %v1344_v17, 0 }
 0x564   :  { %v1342_v25 = vpop.permute.xlu0 %1341 }
 0x566   :  { %v2962_v13 = vpop.eup %2961 }
 0x567   :  { %v1113_v14 = vmul.f32 %v2962_v13, %v2954_v49 }
 0x568   :  { %v1444_v26 = vpop.permute.xlu0 %1443 }
 0x569   :  { %v1117_v18 = vpack.c.bf16 %v1113_v14, %v1113_v14  ;;  %v1449_v27 = vsel %vm432_vm1, %v1444_v26, 0 }
 0x56a   :  { %v2964_v19 = vpop.eup %2963 }
 0x56b   :  { %2747 = vmatmul.mubr.msk.bf16.vlgmr.msra.gmra.mxu0 %vm617_vm3, %v1117_v18  ;;  %v1114_v5 = vmul.f32 %v2964_v19, %v2956_v52 }
 0x56c   :  { %2757 = vmatpush3.bf16.msra.mxu0 %v1270_v20  ;;  %2758 = vmatprep.mubr.msk.bf16.mxu0 %vm3138_vm0, %v3137_v37  ;;  %v1442_v28 = vpop.permute.xlu0 %1441 }
 0x56d   :  { %v1118_v24 = vpack.c.bf16 %v1114_v5, %v1114_v5  ;;  %2768 = vmatprep.subr.bf16.mxu0 %v3137_v37 }
 0x56f   :  { %2753 = vmatmul.mubr.msk.bf16.vlgmr.msra.gmra.mxu1 %vm617_vm3, %v1118_v24 }
 0x570   :  { %2763 = vmatpush3.bf16.xpose.msra.mxu1 %v1349_v45  ;;  %2764 = vmatprep.mubr.msk.bf16.mxu1 %vm3138_vm0, %v3137_v37 }
 0x571   :  { %2774 = vmatprep.subr.bf16.mxu1 %v3137_v37 }
 0x577   :  { %2765 = vmatmul.mubr.msk.bf16.vlgmr.msra.gmra.mxu1 %vm432_vm1, %v1342_v25 }
 0x578   :  { %2775 = vmatpush3.bf16.xpose.msra.mxu1 %v1449_v27  ;;  %2776 = vmatprep.mubr.msk.bf16.mxu1 %vm3138_vm0, %v3137_v37 }
 0x579   :  { %2786 = vmatprep.subr.bf16.mxu1 %v3137_v37 }
 0x57f   :  { %2777 = vmatmul.mubr.msk.bf16.vlgmr.msra.gmra.mxu1 %vm432_vm1, %v1442_v28 }
 0x580   :  { %2788 = vmatprep.mubr.msk.bf16.mxu1 %vm3138_vm0, %v3137_v37 }
 0x58d   :  { %v1107_v30 = vpop.xlane.xlu1 %1106 }
 0x58e   :  { %2965 = vrcp.f32 %v1107_v30 }
 0x591   :  { %v1392_v34 = vpop.permute.xlu1 %1391 }
 0x595   :  { %v1494_v36 = vpop.permute.xlu1 %1493 }
 0x596   :  { %v1499_v38 = vsel %vm432_vm1, %v1494_v36, 0 }
 0x599   :  { %v1492_v39 = vpop.permute.xlu1 %1491 }
 0x59b   :  { %v2966_v31 = vpop.eup %2965 }
 0x59c   :  { %v1115_v32 = vmul.f32 %v2966_v31, %v2958_v58 }
 0x59e   :  { %v1119_v33 = vpack.c.bf16 %v1115_v32, %v1115_v32 }
 0x5a0   :  { %2759 = vmatmul.mubr.msk.bf16.vlgmr.msra.gmra.mxu0 %vm617_vm3, %v1119_v33 }
 0x5a1   :  { %2769 = vmatpush3.bf16.xpose.msra.mxu0 %v1399_v35  ;;  %2770 = vmatprep.mubr.msk.bf16.mxu0 %vm3138_vm0, %v3137_v37 }
 0x5a2   :  { %2780 = vmatprep.subr.bf16.mxu0 %v3137_v37 }
 0x5a8   :  { %2771 = vmatmul.mubr.msk.bf16.vlgmr.msra.gmra.mxu0 %vm432_vm1, %v1392_v34 }
 0x5a9   :  { %2781 = vmatpush3.bf16.xpose.msra.mxu0 %v1499_v38  ;;  %2782 = vmatprep.mubr.msk.bf16.mxu0 %vm3138_vm0, %v3137_v37 }
 0x5aa   :  { %2792 = vmatprep.subr.bf16.mxu0 %v3137_v37 }
 0x5b0   :  { %2783 = vmatmul.mubr.msk.bf16.vlgmr.msra.gmra.mxu0 %vm432_vm1, %v1492_v39 }
 0x5b1   :  { %2794 = vmatprep.mubr.msk.bf16.mxu0 %vm3138_vm0, %v3137_v37 }
 0x5fa   :  { %v3435_v40 = vpop.f32.mrf.mxu1 }
 0x5fc   :  { %v2742_v41 = vpop.f32.mrf.mxu1 }
 0x5fe   :  { %v1165_v42 = vpop.f32.mrf.mxu1 }
 0x600   :  { %v2743_v43 = vpop.f32.mrf.mxu1 }
 0x62b   :  { %v3437_v44 = vpop.f32.mrf.mxu0 }
 0x62d   :  { %v2748_v46 = vpop.f32.mrf.mxu0 }
 0x62f   :  { %v1213_v47 = vpop.f32.mrf.mxu0  ;;  %v3439_v48 = vpop.f32.mrf.mxu1 }
 0x631   :  { %v2749_v49 = vpop.f32.mrf.mxu0  ;;  %v2754_v50 = vpop.f32.mrf.mxu1 }
 0x633   :  { %v1261_v52 = vpop.f32.mrf.mxu1 }
 0x635   :  { %v2755_v53 = vpop.f32.mrf.mxu1 }
 0x637   :  { %v1385_v54 = vpop.f32.mrf.mxu1 }
 0x638   :  { %v1541_v55 = vsel %vm617_vm3, %v1385_v54, -inf }
 0x639   :  { %1542 = vmax.xlane.f32.xlu0 %v1541_v55  ;;  %v2766_v57 = vpop.f32.mrf.mxu1 }
 0x63b   :  { %v1388_v58 = vpop.f32.mrf.mxu1 }
 0x63d   :  { %v2767_v59 = vpop.f32.mrf.mxu1 }
 0x63f   :  { %v1485_v60 = vpop.f32.mrf.mxu1 }
 0x640   :  { %v1547_v61 = vsel %vm617_vm3, %v1485_v60, -inf }
 0x641   :  { %1548 = vmax.xlane.f32.xlu0 %v1547_v61  ;;  %v2778_v62 = vpop.f32.mrf.mxu1 }
 0x643   :  { %v1488_v63 = vpop.f32.mrf.mxu1 }
 0x645   :  { %v2779_v1 = vpop.f32.mrf.mxu1 }
 0x660   :  { %v3443_v3 = vpop.f32.mrf.mxu0 }
 0x662   :  { %v2760_v4 = vpop.f32.mrf.mxu0 }
 0x664   :  { %v1309_v6 = vpop.f32.mrf.mxu0 }
 0x666   :  { %v2761_v7 = vpop.f32.mrf.mxu0 }
 0x668   :  { %v1435_v9 = vpop.f32.mrf.mxu0 }
 0x669   :  { %v1544_v10 = vsel %vm617_vm3, %v1435_v9, -inf }
 0x66a   :  { %1545 = vmax.xlane.f32.xlu1 %v1544_v10  ;;  %v2772_v13 = vpop.f32.mrf.mxu0 }
 0x66c   :  { %v1438_v14 = vpop.f32.mrf.mxu0 }
 0x66e   :  { %v2773_v17 = vpop.f32.mrf.mxu0 }
 0x670   :  { %v1535_v18 = vpop.f32.mrf.mxu0 }
 0x671   :  { %v1550_v19 = vsel %vm617_vm3, %v1535_v18, -inf }
 0x672   :  { %1551 = vmax.xlane.f32.xlu0 %v1550_v19  ;;  %v2784_v20 = vpop.f32.mrf.mxu0 }
 0x674   :  { %v1538_v5 = vpop.f32.mrf.mxu0 }
 0x676   :  { %v2785_v24 = vpop.f32.mrf.mxu0 }
 0x67b   :  { %1637 = vrot.lane.b32.xlu1 %v3279_v21, %s3133_s23 }
 0x67f   :  { %1685 = vrot.lane.b32.xlu1 %v3316_v12, %s3133_s23 }
 0x683   :  { %1733 = vrot.lane.b32.xlu1 %v3325_v23, %s3133_s23 }
 0x6c2   :  { %v1543_v25 = vpop.xlane.xlu0 %1542 }
 0x6c3   :  { %v1553_v45 = vsub.f32 %v1385_v54, %v1543_v25 }
 0x6c5   :  { %v1557_v26 = vmul.f32 1.442695, %v1553_v45 }
 0x6c7   :  { %2967 = vpow2.f32 %v1557_v26 }
 0x6ca   :  { %v1549_v29 = vpop.xlane.xlu0 %1548 }
 0x6cb   :  { %v1555_v30 = vsub.f32 %v1485_v60, %v1549_v29 }
 0x6cd   :  { %v1561_v33 = vmul.f32 1.442695, %v1555_v30 }
 0x6d4   :  { %v2968_v27 = vpop.eup %2967 }
 0x6d5   :  { %v1565_v28 = vsel %vm617_vm3, %v2968_v27, 0.0 }
 0x6d6   :  { %1566 = vadd.xlane.f32.xlu0 %v1565_v28 }
 0x6ec   :  { %1589 = vrot.lane.b32.xlu0 %v3234_v56, %s3133_s23 }
 0x6f3   :  { %v1546_v31 = vpop.xlane.xlu1 %1545 }
 0x6f4   :  { %v1554_v32 = vsub.f32 %v1435_v9, %v1546_v31 }
 0x6f6   :  { %v1559_v34 = vmul.f32 1.442695, %v1554_v32 }
 0x6f7   :  { %v1638_v35 = vpop.permute.xlu1 %1637 }
 0x6f8   :  { %2969 = vpow2.f32 %v1559_v34  ;;  %v1643_v36 = vsel %vm669_vm2, %v1638_v35, 0 }
 0x6f9   :  { %2793 = vmatpush3.bf16.msra.mxu0 %v1643_v36  ;;  %2971 = vpow2.f32 %v1561_v33 }
 0x6fa   :  { %2804 = vmatprep.subr.bf16.mxu0 %v3137_v37 }
 0x6fb   :  { %v1552_v43 = vpop.xlane.xlu0 %1551  ;;  %v1686_v52 = vpop.permute.xlu1 %1685 }
 0x6fc   :  { %v1556_v46 = vsub.f32 %v1535_v18, %v1552_v43 }
 0x6fe   :  { %v1563_v47 = vmul.f32 1.442695, %v1556_v46 }
 0x700   :  { %2973 = vpow2.f32 %v1563_v47 }
 0x705   :  { %v2970_v38 = vpop.eup %2969 }
 0x706   :  { %v1568_v39 = vsel %vm617_vm3, %v2970_v38, 0.0  ;;  %v2972_v41 = vpop.eup %2971 }
 0x707   :  { %1569 = vadd.xlane.f32.xlu1 %v1568_v39  ;;  %v1571_v42 = vsel %vm617_vm3, %v2972_v41, 0.0 }
 0x70b   :  { %1572 = vadd.xlane.f32.xlu0 %v1571_v42 }
 0x70d   :  { %v2974_v49 = vpop.eup %2973 }
 0x70e   :  { %v1574_v50 = vsel %vm617_vm3, %v2974_v49, 0.0 }
 0x718   :  { %1862 = vrot.lane.b32.xlu1 %v3241_v0, %s3140_s5 }
 0x721   :  { %1812 = vrot.lane.b32.xlu0 %v3231_v51, %s3140_s5 }
 0x725   :  { %1810 = vrot.lane.b32.xlu0 %v3244_v2, %s3140_s5 }
 0x729   :  { %1912 = vrot.lane.b32.xlu0 %v3255_v8, %s3140_s5 }
 0x72d   :  { %1910 = vrot.lane.b32.xlu0 %v3269_v16, %s3140_s5 }
 0x73c   :  { %1575 = vadd.xlane.f32.xlu1 %v1574_v50 }
 0x74d   :  { %1860 = vrot.lane.b32.xlu1 %v3258_v11, %s3140_s5  ;;  %v1691_v11 = vsel %vm669_vm2, %v1686_v52, 0 }
 0x751   :  { %1962 = vrot.lane.b32.xlu1 %v3266_v15, %s3140_s5  ;;  %v1734_v15 = vpop.permute.xlu1 %1733 }
 0x752   :  { %v1739_v61 = vsel %vm669_vm2, %v1734_v15, 0 }
 0x755   :  { %1960 = vrot.lane.b32.xlu1 %v3281_v22, %s3140_s5 }
 0x75f   :  { %v1567_v51 = vpop.xlane.xlu0 %1566 }
 0x760   :  { %2975 = vrcp.f32 %v1567_v51 }
 0x763   :  { %v1590_v0 = vpop.permute.xlu0 %1589 }
 0x764   :  { %v1595_v2 = vsel %vm669_vm2, %v1590_v0, 0 }
 0x765   :  { %2787 = vmatpush3.bf16.msra.mxu1 %v1595_v2 }
 0x766   :  { %2798 = vmatprep.subr.bf16.mxu1 %v3137_v37 }
 0x76d   :  { %v2976_v8 = vpop.eup %2975 }
 0x76e   :  { %v1581_v16 = vmul.f32 %v2976_v8, %v2968_v27 }
 0x770   :  { %v1585_v53 = vpack.c.bf16 %v1581_v16, %v1581_v16 }
 0x772   :  { %2789 = vmatmul.mubr.msk.bf16.vlgmr.msra.gmra.mxu1 %vm617_vm3, %v1585_v53 }
 0x773   :  { %2799 = vmatpush3.bf16.msra.mxu1 %v1691_v11  ;;  %2800 = vmatprep.mubr.msk.bf16.mxu1 %vm3138_vm0, %v3137_v37 }
 0x774   :  { %2810 = vmatprep.subr.bf16.mxu1 %v3137_v37 }
 0x790   :  { %v1570_v22 = vpop.xlane.xlu1 %1569 }
 0x791   :  { %2977 = vrcp.f32 %v1570_v22 }
 0x794   :  { %v1573_v54 = vpop.xlane.xlu0 %1572  ;;  %v1863_v10 = vpop.permute.xlu1 %1862 }
 0x795   :  { %2979 = vrcp.f32 %v1573_v54  ;;  %v1868_v20 = vsel %vm432_vm1, %v1863_v10, 0 }
 0x798   :  { %v1813_v58 = vpop.permute.xlu0 %1812 }
 0x799   :  { %v1818_v4 = vsel %vm432_vm1, %v1813_v58, 0 }
 0x79c   :  { %v1811_v1 = vpop.permute.xlu0 %1810 }
 0x79e   :  { %v2978_v55 = vpop.eup %2977 }
 0x79f   :  { %v1582_v57 = vmul.f32 %v2978_v55, %v2970_v38 }
 0x7a0   :  { %v1913_v6 = vpop.permute.xlu0 %1912 }
 0x7a1   :  { %v1586_v59 = vpack.c.bf16 %v1582_v57, %v1582_v57  ;;  %v1918_v7 = vsel %vm432_vm1, %v1913_v6, 0 }
 0x7a2   :  { %v2980_v60 = vpop.eup %2979 }
 0x7a3   :  { %2795 = vmatmul.mubr.msk.bf16.vlgmr.msra.gmra.mxu0 %vm617_vm3, %v1586_v59  ;;  %v1583_v62 = vmul.f32 %v2980_v60, %v2972_v41 }
 0x7a4   :  { %2805 = vmatpush3.bf16.msra.mxu0 %v1739_v61  ;;  %2806 = vmatprep.mubr.msk.bf16.mxu0 %vm3138_vm0, %v3137_v37  ;;  %v1911_v9 = vpop.permute.xlu0 %1910 }
 0x7a5   :  { %v1587_v63 = vpack.c.bf16 %v1583_v62, %v1583_v62  ;;  %2816 = vmatprep.subr.bf16.mxu0 %v3137_v37 }
 0x7a7   :  { %2801 = vmatmul.mubr.msk.bf16.vlgmr.msra.gmra.mxu1 %vm617_vm3, %v1587_v63 }
 0x7a8   :  { %2811 = vmatpush3.bf16.xpose.msra.mxu1 %v1818_v4  ;;  %2812 = vmatprep.mubr.msk.bf16.mxu1 %vm3138_vm0, %v3137_v37 }
 0x7a9   :  { %2822 = vmatprep.subr.bf16.mxu1 %v3137_v37 }
 0x7af   :  { %2813 = vmatmul.mubr.msk.bf16.vlgmr.msra.gmra.mxu1 %vm432_vm1, %v1811_v1 }
 0x7b0   :  { %2823 = vmatpush3.bf16.xpose.msra.mxu1 %v1918_v7  ;;  %2824 = vmatprep.mubr.msk.bf16.mxu1 %vm3138_vm0, %v3137_v37 }
 0x7b1   :  { %2834 = vmatprep.subr.bf16.mxu1 %v3137_v37 }
 0x7b7   :  { %2825 = vmatmul.mubr.msk.bf16.vlgmr.msra.gmra.mxu1 %vm432_vm1, %v1911_v9 }
 0x7b8   :  { %2836 = vmatprep.mubr.msk.bf16.mxu1 %vm3138_vm0, %v3137_v37 }
 0x7c5   :  { %v1576_v13 = vpop.xlane.xlu1 %1575 }
 0x7c6   :  { %2981 = vrcp.f32 %v1576_v13 }
 0x7c9   :  { %v1861_v19 = vpop.permute.xlu1 %1860 }
 0x7cd   :  { %v1963_v5 = vpop.permute.xlu1 %1962 }
 0x7ce   :  { %v1968_v24 = vsel %vm432_vm1, %v1963_v5, 0 }
 0x7d1   :  { %v1961_v25 = vpop.permute.xlu1 %1960 }
 0x7d3   :  { %v2982_v14 = vpop.eup %2981 }
 0x7d4   :  { %v1584_v17 = vmul.f32 %v2982_v14, %v2974_v49 }
 0x7d6   :  { %v1588_v18 = vpack.c.bf16 %v1584_v17, %v1584_v17  ;;  %v2550_v17 = vpack.c.bf16 %v3435_v40, %v3435_v40 }
 0x7d8   :  { %2807 = vmatmul.mubr.msk.bf16.vlgmr.msra.gmra.mxu0 %vm617_vm3, %v1588_v18 }
 0x7d9   :  { %2817 = vmatpush3.bf16.xpose.msra.mxu0 %v1868_v20  ;;  %2818 = vmatprep.mubr.msk.bf16.mxu0 %vm3138_vm0, %v3137_v37 }
 0x7da   :  { %2828 = vmatprep.subr.bf16.mxu0 %v3137_v37 }
 0x7e0   :  { %2819 = vmatmul.mubr.msk.bf16.vlgmr.msra.gmra.mxu0 %vm432_vm1, %v1861_v19  ;;  %v2552_v19 = vpack.c.bf16 %v3439_v48, %v3439_v48 }
 0x7e1   :  { %2829 = vmatpush3.bf16.xpose.msra.mxu0 %v1968_v24  ;;  %2830 = vmatprep.mubr.msk.bf16.mxu0 %vm3138_vm0, %v3137_v37 }
 0x7e2   :  { %2840 = vmatprep.subr.bf16.mxu0 %v3137_v37 }
 0x7e8   :  { %2831 = vmatmul.mubr.msk.bf16.vlgmr.msra.gmra.mxu0 %vm432_vm1, %v1961_v25 }
 0x7e9   :  { %2842 = vmatprep.mubr.msk.bf16.mxu0 %vm3138_vm0, %v3137_v37 }
 0x832   :  { %v3515_v45 = vpop.f32.mrf.mxu1 }
 0x833   :  { %v2554_v20 = vpack.c.bf16 %v3515_v45, %v3515_v45 }
 0x834   :  { %v2790_v26 = vpop.f32.mrf.mxu1 }
 0x836   :  { %v1634_v27 = vpop.f32.mrf.mxu1 }
 0x837   :  { %v2551_v27 = vpack.c.bf16 %v3437_v44, %v3437_v44 }
 0x838   :  { %v2791_v28 = vpop.f32.mrf.mxu1 }
 0x863   :  { %v3517_v29 = vpop.f32.mrf.mxu0 }
 0x865   :  { %v2796_v30 = vpop.f32.mrf.mxu0 }
 0x867   :  { %v1682_v31 = vpop.f32.mrf.mxu0  ;;  %v1727_v32 = vpop.f32.mrf.mxu1 }
 0x868   :  { %v2556_v5 = vpack.c.bf16 %v1727_v32, %v1727_v32 }
 0x869   :  { %v2797_v33 = vpop.f32.mrf.mxu0  ;;  %v2802_v34 = vpop.f32.mrf.mxu1 }
 0x86b   :  { %v1730_v35 = vpop.f32.mrf.mxu1 }
 0x86d   :  { %v2803_v36 = vpop.f32.mrf.mxu1 }
 0x86f   :  { %v1854_v38 = vpop.f32.mrf.mxu1 }
 0x870   :  { %v2010_v39 = vsel %vm617_vm3, %v1854_v38, -inf }
 0x871   :  { %2011 = vmax.xlane.f32.xlu0 %v2010_v39  ;;  %v2814_v41 = vpop.f32.mrf.mxu1 }
 0x873   :  { %v1857_v42 = vpop.f32.mrf.mxu1 }
 0x875   :  { %v2815_v43 = vpop.f32.mrf.mxu1 }
 0x877   :  { %v1954_v46 = vpop.f32.mrf.mxu1 }
 0x878   :  { %v2016_v47 = vsel %vm617_vm3, %v1954_v46, -inf }
 0x879   :  { %2017 = vmax.xlane.f32.xlu0 %v2016_v47  ;;  %v2826_v49 = vpop.f32.mrf.mxu1 }
 0x87b   :  { %v1957_v50 = vpop.f32.mrf.mxu1 }
 0x87d   :  { %v2827_v51 = vpop.f32.mrf.mxu1 }
 0x898   :  { %v3521_v0 = vpop.f32.mrf.mxu0 }
 0x899   :  { %v2557_v28 = vpack.c.bf16 %v3521_v0, %v3521_v0 }
 0x89a   :  { %v2808_v2 = vpop.f32.mrf.mxu0 }
 0x89c   :  { %v1778_v8 = vpop.f32.mrf.mxu0 }
 0x89e   :  { %v2809_v16 = vpop.f32.mrf.mxu0 }
 0x8a0   :  { %v1904_v52 = vpop.f32.mrf.mxu0 }
 0x8a1   :  { %v2013_v53 = vsel %vm617_vm3, %v1904_v52, -inf }
 0x8a2   :  { %2014 = vmax.xlane.f32.xlu1 %v2013_v53  ;;  %v2820_v11 = vpop.f32.mrf.mxu0 }
 0x8a4   :  { %v1907_v15 = vpop.f32.mrf.mxu0 }
 0x8a6   :  { %v2821_v22 = vpop.f32.mrf.mxu0 }
 0x8a8   :  { %v2004_v54 = vpop.f32.mrf.mxu0 }
 0x8a9   :  { %v2019_v55 = vsel %vm617_vm3, %v2004_v54, -inf }
 0x8aa   :  { %2020 = vmax.xlane.f32.xlu0 %v2019_v55  ;;  %v2832_v57 = vpop.f32.mrf.mxu0 }
 0x8ac   :  { %v2007_v58 = vpop.f32.mrf.mxu0 }
 0x8ae   :  { %v2833_v59 = vpop.f32.mrf.mxu0 }
 0x8fa   :  { %v2012_v60 = vpop.xlane.xlu0 %2011 }
 0x8fb   :  { %v2022_v61 = vsub.f32 %v1854_v38, %v2012_v60 }
 0x8fd   :  { %v2026_v62 = vmul.f32 1.442695, %v2022_v61 }
 0x8ff   :  { %2983 = vpow2.f32 %v2026_v62 }
 0x902   :  { %v2018_v63 = vpop.xlane.xlu0 %2017 }
 0x903   :  { %v2024_v1 = vsub.f32 %v1954_v46, %v2018_v63 }
 0x905   :  { %v2030_v4 = vmul.f32 1.442695, %v2024_v1 }
 0x907   :  { %2985 = vpow2.f32 %v2030_v4  ;;  %v2926_v4 = vld [vmem:[#allocation11 + $0x38] sm:$0xff]  }
 0x90c   :  { %v2984_v6 = vpop.eup %2983 }
 0x90d   :  { %v2034_v7 = vsel %vm617_vm3, %v2984_v6, 0.0 }
 0x90e   :  { %2035 = vadd.xlane.f32.xlu0 %v2034_v7 }
 0x914   :  { %v3526_v9 = vpop.eup %2985 }
 0x915   :  { %v2040_v10 = vsel %vm617_vm3, %v3526_v9, 0.0 }
 0x916   :  { %2041 = vadd.xlane.f32.xlu0 %v2040_v10 }
 0x92b   :  { %v2015_v13 = vpop.xlane.xlu1 %2014 }
 0x92c   :  { %v2023_v14 = vsub.f32 %v1904_v52, %v2015_v13  ;;  %2058 = vrot.lane.b32.xlu0 %v3234_v56, %s3140_s5 }
 0x92e   :  { %v2028_v18 = vmul.f32 1.442695, %v2023_v14  ;;  %v2928_v14 = vld [vmem:[#allocation11 + $0x28] sm:$0xff]  }
 0x930   :  { %2987 = vpow2.f32 %v2028_v18  ;;  %1324 = vrot.lane.b32.xlu0 %v2550_v17, %s3140_s5 }
 0x933   :  { %v2021_v48 = vpop.xlane.xlu0 %2020 }
 0x934   :  { %1328 = vrot.lane.b32.xlu0 %v2552_v19, %s3140_s5  ;;  %v2025_v24 = vsub.f32 %v2004_v54, %v2021_v48  ;;  %v2929_v19 = vld [vmem:[#allocation11 + $0x20] sm:$0xff]  }
 0x936   :  { %v2032_v25 = vmul.f32 1.442695, %v2025_v24 }
 0x938   :  { %1793 = vrot.lane.b32.xlu0 %v2554_v20, %s3133_s23  ;;  %2989 = vpow2.f32 %v2032_v25  ;;  %v2930_v20 = vld [vmem:[#allocation11 + $0x18] sm:$0xff]  }
 0x93c   :  { %1797 = vrot.lane.b32.xlu0 %v2556_v5, %s3133_s23  ;;  %v2931_v5 = vld [vmem:[#allocation11 + $0x10] sm:$0xff]  }
 0x93d   :  { %v2988_v56 = vpop.eup %2987 }
 0x93e   :  { %v2037_v40 = vsel %vm617_vm3, %v2988_v56, 0.0 }
 0x93f   :  { %2038 = vadd.xlane.f32.xlu1 %v2037_v40  ;;  %v2933_v40 = vld [vmem:[#allocation11] sm:$0xff]  }
 0x945   :  { %v3547_v45 = vpop.eup %2989 }
 0x946   :  { %v2043_v26 = vsel %vm617_vm3, %v3547_v45, 0.0 }
 0x950   :  { %2106 = vrot.lane.b32.xlu1 %v3279_v21, %s3140_s5  ;;  %v2553_v21 = vpack.c.bf16 %v3443_v3, %v3443_v3 }
 0x954   :  { %2154 = vrot.lane.b32.xlu1 %v3316_v12, %s3140_s5  ;;  %v2555_v12 = vpack.c.bf16 %v3517_v29, %v3517_v29 }
 0x978   :  { %2044 = vadd.xlane.f32.xlu1 %v2043_v26 }
 0x989   :  { %2202 = vrot.lane.b32.xlu1 %v3325_v23, %s3140_s5 }
 0x98d   :  { %1326 = vrot.lane.b32.xlu1 %v2551_v27, %s3140_s5 }
 0x991   :  { %1330 = vrot.lane.b32.xlu1 %v2553_v21, %s3140_s5 }
 0x995   :  { %1795 = vrot.lane.b32.xlu1 %v2555_v12, %s3133_s23 }
 0x997   :  { %v2036_v30 = vpop.xlane.xlu0 %2035 }
 0x998   :  { %2991 = vrcp.f32 %v2036_v30 }
 0x999   :  { %1799 = vrot.lane.b32.xlu1 %v2557_v28, %s3133_s23 }
 0x99f   :  { %v2042_v23 = vpop.xlane.xlu0 %2041 }
 0x9a0   :  { %2993 = vrcp.f32 %v2042_v23 }
 0x9a3   :  { %v2059_v44 = vpop.permute.xlu0 %2058 }
 0x9a4   :  { %v2064_v31 = vsel %vm669_vm2, %v2059_v44, 0  ;;  %v2523_v44 = vld [vmem:[%s3609_s7] ss:$0 sm:$0xff] }
 0x9a5   :  { %v2992_v32 = vpop.eup %2991  ;;  %2835 = vmatpush3.bf16.msra.mxu1 %v2064_v31 }
 0x9a6   :  { %v2050_v3 = vmul.f32 %v2992_v32, %v2984_v6  ;;  %2846 = vmatprep.subr.bf16.mxu1 %v3137_v37  ;;  %v2927_v6 = vld [vmem:[#allocation11 + $0x30] sm:$0xff]  }
 0x9a7   :  { %v1325_v29 = vpop.permute.xlu0 %1324 }
 0x9a8   :  { %1337 = vst.msk [vmem:[#allocation2] sm:$0xf] %vm1336_vm5, %v1325_v29  ;;  %v2054_v33 = vpack.c.bf16 %v2050_v3, %v2050_v3 }
 0x9aa   :  { %2837 = vmatmul.mubr.msk.bf16.vlgmr.msra.gmra.mxu1 %vm617_vm3, %v2054_v33 }
 0x9ab   :  { %v1329_v34 = vpop.permute.xlu0 %1328  ;;  %2848 = vmatprep.mubr.msk.bf16.mxu1 %vm3138_vm0, %v3137_v37 }
 0x9ac   :  { %1339 = vst.msk [vmem:[#allocation2 + $0x8] sm:$0xf] %vm1336_vm5, %v1329_v34 }
 0x9ad   :  { %v2994_v39 = vpop.eup %2993 }
 0x9ae   :  { %v2052_v43 = vmul.f32 %v2994_v39, %v3526_v9 }
 0x9af   :  { %v1794_v35 = vpop.permute.xlu0 %1793 }
 0x9b0   :  { %1806 = vst.msk [vmem:[#allocation2] sm:$0xf] %vm1805_vm6, %v1794_v35  ;;  %v2056_v49 = vpack.c.bf16 %v2052_v43, %v2052_v43 }
 0x9b3   :  { %v1798_v36 = vpop.permute.xlu0 %1797 }
 0x9b4   :  { %1808 = vst.msk [vmem:[#allocation2 + $0x8] sm:$0xf] %vm1805_vm6, %v1798_v36 }
 0x9c8   :  { %v2039_v38 = vpop.xlane.xlu1 %2038 }
 0x9c9   :  { %2995 = vrcp.f32 %v2039_v38 }
 0x9cc   :  { %v2107_v41 = vpop.permute.xlu1 %2106 }
 0x9cd   :  { %v2112_v42 = vsel %vm669_vm2, %v2107_v41, 0 }
 0x9ce   :  { %2841 = vmatpush3.bf16.msra.mxu0 %v2112_v42 }
 0x9cf   :  { %2852 = vmatprep.subr.bf16.mxu0 %v3137_v37 }
 0x9d0   :  { %v2155_v46 = vpop.permute.xlu1 %2154 }
 0x9d1   :  { %v2160_v47 = vsel %vm669_vm2, %v2155_v46, 0 }
 0x9d2   :  { %2847 = vmatpush3.bf16.msra.mxu1 %v2160_v47 }
 0x9d3   :  { %2858 = vmatprep.subr.bf16.mxu1 %v2926_v4 }
 0x9d5   :  { %2849 = vmatmul.mubr.msk.bf16.vlgmr.msra.gmra.mxu1 %vm617_vm3, %v2056_v49 }
 0x9d6   :  { %v2996_v50 = vpop.eup %2995  ;;  %2859 = vmatpush3.bf16.msra.mxu1 %v2926_v4 }
 0x9d7   :  { %v2051_v51 = vmul.f32 %v2996_v50, %v2988_v56  ;;  %2860 = vmatprep.subr.bf16.mxu1 %v2927_v6  ;;  %v2932_v56 = vld [vmem:[#allocation11 + $0x8] sm:$0xff]  }
 0x9d9   :  { %v2055_v0 = vpack.c.bf16 %v2051_v51, %v2051_v51 }
 0x9da   :  { %2861 = vmatpush3.bf16.msra.mxu1 %v2927_v6 }
 0x9db   :  { %2843 = vmatmul.mubr.msk.bf16.vlgmr.msra.gmra.mxu0 %vm617_vm3, %v2055_v0  ;;  %2862 = vmatprep.subr.bf16.mxu1 %v2928_v14 }
 0x9dc   :  { %2854 = vmatprep.mubr.msk.bf16.mxu0 %vm3138_vm0, %v3137_v37 }
 0x9de   :  { %2863 = vmatpush3.bf16.msra.mxu1 %v2928_v14 }
 0x9df   :  { %2864 = vmatprep.subr.bf16.mxu1 %v2929_v19 }
 0x9e2   :  { %2865 = vmatpush3.bf16.msra.mxu1 %v2929_v19 }
 0x9e3   :  { %2866 = vmatprep.subr.bf16.mxu1 %v2930_v20 }
 0x9e6   :  { %2867 = vmatpush3.bf16.msra.mxu1 %v2930_v20 }
 0x9e7   :  { %2868 = vmatprep.subr.bf16.mxu1 %v2931_v5 }
 0x9ea   :  { %2869 = vmatpush3.bf16.msra.mxu1 %v2931_v5 }
 0x9eb   :  { %2870 = vmatprep.subr.bf16.mxu1 %v2932_v56 }
 0x9ee   :  { %2871 = vmatpush3.bf16.msra.mxu1 %v2932_v56 }
 0x9ef   :  { %2872 = vmatprep.subr.bf16.mxu1 %v2933_v40 }
 0x9f2   :  { %2873 = vmatpush3.bf16.msra.mxu1 %v2933_v40 }
 0xa01   :  { %v2045_v2 = vpop.xlane.xlu1 %2044 }
 0xa02   :  { %2997 = vrcp.f32 %v2045_v2 }
 0xa05   :  { %v2203_v8 = vpop.permute.xlu1 %2202 }
 0xa06   :  { %v2208_v16 = vsel %vm669_vm2, %v2203_v8, 0 }
 0xa07   :  { %2853 = vmatpush3.bf16.msra.mxu0 %v2208_v16 }
 0xa09   :  { %v1327_v52 = vpop.permute.xlu1 %1326 }
 0xa0a   :  { %1338 = vst.msk [vmem:[#allocation2 + $0x4] sm:$0xf] %vm1336_vm5, %v1327_v52 }
 0xa0d   :  { %v1331_v53 = vpop.permute.xlu1 %1330 }
 0xa0e   :  { %1340 = vst.msk [vmem:[#allocation2 + $0xc] sm:$0xf] %vm1336_vm5, %v1331_v53 }
 0xa0f   :  { %v2998_v11 = vpop.eup %2997 }
 0xa10   :  { %v2053_v15 = vmul.f32 %v2998_v11, %v3547_v45 }
 0xa11   :  { %v1796_v22 = vpop.permute.xlu1 %1795 }
 0xa12   :  { %1807 = vst.msk [vmem:[#allocation2 + $0x4] sm:$0xf] %vm1805_vm6, %v1796_v22  ;;  %v2057_v54 = vpack.c.bf16 %v2053_v15, %v2053_v15 }
 0xa14   :  { %2855 = vmatmul.mubr.msk.bf16.vlgmr.msra.gmra.mxu0 %vm617_vm3, %v2057_v54 }
 0xa15   :  { %v1800_v37 = vpop.permute.xlu1 %1799 }
 0xa16   :  { %1809 = vst.msk [vmem:[#allocation2 + $0xc] sm:$0xf] %vm1805_vm6, %v1800_v37 }
 0xa6a   :  { %v2100_v55 = vpop.f32.mrf.mxu1 }
 0xa6b   :  { %v2558_v57 = vpack.c.bf16 %v2100_v55, %v2100_v55 }
 0xa6c   :  { %v2838_v58 = vpop.f32.mrf.mxu1 }
 0xa6d   :  { %2262 = vrot.lane.b32.xlu0 %v2558_v57, %s3139_s3 }
 0xa6e   :  { %v2103_v59 = vpop.f32.mrf.mxu1 }
 0xa70   :  { %v2839_v60 = vpop.f32.mrf.mxu1 }
 0xa95   :  { %v2196_v61 = vpop.f32.mrf.mxu1 }
 0xa96   :  { %v2560_v62 = vpack.c.bf16 %v2196_v61, %v2196_v61 }
 0xa97   :  { %v2850_v63 = vpop.f32.mrf.mxu1 }
 0xa98   :  { %2266 = vrot.lane.b32.xlu0 %v2560_v62, %s3139_s3 }
 0xa99   :  { %v2199_v1 = vpop.f32.mrf.mxu1 }
 0xa9b   :  { %v2148_v7 = vpop.f32.mrf.mxu0  ;;  %v2851_v9 = vpop.f32.mrf.mxu1 }
 0xa9c   :  { %v2559_v10 = vpack.c.bf16 %v2148_v7, %v2148_v7 }
 0xa9d   :  { %v2844_v13 = vpop.f32.mrf.mxu0 }
 0xa9e   :  { %2264 = vrot.lane.b32.xlu1 %v2559_v10, %s3139_s3 }
 0xa9f   :  { %v2151_v17 = vpop.f32.mrf.mxu0 }
 0xaa1   :  { %v2845_v18 = vpop.f32.mrf.mxu0 }
 0xad4   :  { %v2244_v48 = vpop.f32.mrf.mxu0 }
 0xad5   :  { %v2561_v24 = vpack.c.bf16 %v2244_v48, %v2244_v48 }
 0xad6   :  { %v2856_v25 = vpop.f32.mrf.mxu0 }
 0xad7   :  { %2268 = vrot.lane.b32.xlu1 %v2561_v24, %s3139_s3 }
 0xad8   :  { %v2247_v45 = vpop.f32.mrf.mxu0 }
 0xada   :  { %v2857_v26 = vpop.f32.mrf.mxu0 }
 0xadf   :  { %v2263_v27 = vpop.permute.xlu0 %2262 }
 0xae0   :  { %2275 = vst.msk [vmem:[#allocation2] sm:$0xf] %vm2274_vm7, %v2263_v27 }
 0xb0a   :  { %v2267_v21 = vpop.permute.xlu0 %2266 }
 0xb0b   :  { %2277 = vst.msk [vmem:[#allocation2 + $0x8] sm:$0xf] %vm2274_vm7, %v2267_v21 }
 0xb10   :  { %v2265_v12 = vpop.permute.xlu1 %2264 }
 0xb11   :  { %2276 = vst.msk [vmem:[#allocation2 + $0x4] sm:$0xf] %vm2274_vm7, %v2265_v12 }
 0xb18   :  { %v2925_v28 = vld [vmem:[#allocation2] sm:$0xff]  }
 0xb19   :  { %2874 = vmatprep.mubr.bf16.mxu1 %v2925_v28 }
 0xb49   :  { %v2269_v30 = vpop.permute.xlu1 %2268 }
 0xb4a   :  { %2278 = vst.msk [vmem:[#allocation2 + $0xc] sm:$0xf] %vm2274_vm7, %v2269_v30 }
 0xb51   :  { %v2934_v23 = vld [vmem:[#allocation2 + $0x8] sm:$0xff]  }
 0xb52   :  { %2875 = vmatmul.mubr.bf16.vlgmr.msra.gmra.mxu1 %v2934_v23 }
 0xc12   :  { %v2876_v31 = vpop.f32.mrf.mxu1 }
 0xc13   :  { %v2409_v32 = vadd.f32 %v2876_v31, %v2523_v44 }
 0xc14   :  { %v2400_v3 = vpop.f32.mrf.mxu1 }
 0xc15   :  { %2417 = vst [vmem:[#allocation12 + $0x10] sm:$0xff] %v2409_v32  ;;  %v2401_v29 = vadd.f32 %v2523_v44, %v2400_v3 }
 0xc16   :  { %v2877_v33 = vpop.f32.mrf.mxu1 }
 0xc17   :  { %2415 = vst [vmem:[#allocation12] sm:$0xff] %v2401_v29  ;;  %v2412_v34 = vadd.f32 %v2877_v33, %v2523_v44 }
 0xc18   :  { %v2403_v35 = vpop.f32.mrf.mxu1 }
 0xc19   :  { %2418 = vst [vmem:[#allocation12 + $0x18] sm:$0xff] %v2412_v34  ;;  %v2404_v36 = vadd.f32 %v2523_v44, %v2403_v35 }
 0xc1b   :  { %2416 = vst [vmem:[#allocation12 + $0x8] sm:$0xff] %v2404_v36 }
 0xc1c   :  { %3110 = shalt.err (!%p3107_p1)
}
 0xc1d   :  { %2430 = dma.vmem_to_hbm [thread:$0]  %s2425_s16, 512, %s3610_s8, [#allocation5], %s3129_s10, %s3129_s10, %s3130_s11  }
 0xc1e   :  { %3125 = dma.done.wait [#allocation5], 512  }
 0xc1f   :  { %3126 = vsyncadd [#allocation5], 4294966784 }
 0xc20   :  { %2434 = vsyncpa [#allocation4], 1 }
 0xc21   :  { %2435 = vsyncpa [#allocation7], 1 }
 0xc22   :  { %2436 = vsyncpa [#allocation10], 1 }
 0xc23   :  { %2437 = vsyncpa [#allocation5], 1 }

</bundles_post_ra>
